<compile_context>
chip_gen: v7x
topology: tpu7x:2x2x1
jax: 0.10.0
libtpu: 0.0.40
codegen_flags: <defaults>
</compile_context>

<pallas_src>
import functools
import math

import jax
import jax.numpy as jnp
import numpy as np
from jax import lax
from jax.experimental import pallas as pl
from jax.experimental.pallas import tpu as pltpu

NODE_FEATURES = 5                 # node_features; node_features + 4 == 9
SEQ_LEN = 4
HIDDEN = 2
FEAT_OUT = SEQ_LEN * HIDDEN + 1   # 9
SUB = 8                           # sublanes per node-slab
X_ROWS = NODE_FEATURES * SUB      # 40
F_ROWS = FEAT_OUT * SUB           # 72
GN_EPS = 1e-5
LEAKY_SLOPE = 0.01

# flat SMEM parameter-vector layout (float32)
P_W_IH = 0                        # 6   (rows r0,r1,z0,z1,n0,n1; input size 1)
P_W_HH = 6                        # 12  (row-major [3H, H])
P_B_IH = 18                       # 6
P_B_HH = 24                       # 6
P_GN_W = 30                       # 9
P_GN_B = 39                       # 9
P_GN_MS = 48                      # 9
P_FC_W = 57                       # 9
P_FC_B = 66                       # 1
PAR_LEN = 67


def _next_pow2(x):
    return 1 << (max(int(x), 1) - 1).bit_length()


def _round_up(x, m):
    return (x + m - 1) // m * m


# ---------------------------------------------------------------------------
# in-kernel building blocks
# ---------------------------------------------------------------------------
def _load_gru_params(par_ref):
    """Read the GRU parameters once per kernel invocation as SMEM scalars."""
    wih = [par_ref[P_W_IH + i] for i in range(3 * HIDDEN)]
    whh = [[par_ref[P_W_HH + 2 * i + c] for c in range(HIDDEN)]
           for i in range(3 * HIDDEN)]
    bih = [par_ref[P_B_IH + i] for i in range(3 * HIDDEN)]
    bhh = [par_ref[P_B_HH + i] for i in range(3 * HIDDEN)]
    return wih, whh, bih, bhh


def _strip_mask(lane_base, sw, total_lanes, n):
    """1.0 for valid nodes, 0.0 for padding (node index = sublane*L + lane)."""
    sub = lax.broadcasted_iota(jnp.int32, (SUB, sw), 0)
    lane = lax.broadcasted_iota(jnp.int32, (SUB, sw), 1)
    return ((sub * total_lanes + lane_base + lane) < n).astype(jnp.float32)


def _gru_strip(gru_p, x_ref, feat_ref, off, sw, mask):
    """4-step GRU on one [8, sw] node strip; writes masked feature slabs."""
    wih, whh, bih, bhh = gru_p
    h = [jnp.zeros((SUB, sw), jnp.float32) for _ in range(HIDDEN)]
    for t in range(SEQ_LEN):
        xt = x_ref[SUB * t:SUB * (t + 1), pl.ds(off, sw)]
        r, z, ghn = [], [], []
        for c in range(HIDDEN):
            gh_r = whh[c][0] * h[0] + whh[c][1] * h[1] + bhh[c]
            gh_z = (whh[HIDDEN + c][0] * h[0] + whh[HIDDEN + c][1] * h[1]
                    + bhh[HIDDEN + c])
            gh_n = (whh[2 * HIDDEN + c][0] * h[0] + whh[2 * HIDDEN + c][1] * h[1]
                    + bhh[2 * HIDDEN + c])
            r.append(jax.nn.sigmoid(wih[c] * xt + bih[c] + gh_r))
            z.append(jax.nn.sigmoid(wih[HIDDEN + c] * xt + bih[HIDDEN + c] + gh_z))
            ghn.append(gh_n)
        for c in range(HIDDEN):
            n_c = jnp.tanh(wih[2 * HIDDEN + c] * xt + bih[2 * HIDDEN + c]
                           + r[c] * ghn[c])
            h[c] = (1.0 - z[c]) * n_c + z[c] * h[c]
            k = HIDDEN * t + c
            feat_ref[SUB * k:SUB * (k + 1), pl.ds(off, sw)] = h[c] * mask
    x_last = x_ref[SUB * (NODE_FEATURES - 1):SUB * NODE_FEATURES, pl.ds(off, sw)]
    feat_ref[SUB * (FEAT_OUT - 1):SUB * FEAT_OUT, pl.ds(off, sw)] = x_last * mask


def _apply_strip(feat_ref, out_ref, off, sw, a, b, w, bias):
    """GraphNorm affine + leaky_relu + 9->1 linear on one node strip."""
    acc = jnp.zeros((SUB, sw), jnp.float32)
    for k in range(FEAT_OUT):
        f = feat_ref[SUB * k:SUB * (k + 1), pl.ds(off, sw)]
        v = a[k] * f + b[k]
        acc = acc + w[k] * jnp.where(v > 0, v, LEAKY_SLOPE * v)
    out_ref[:, pl.ds(off, sw)] = acc + bias


# ---------------------------------------------------------------------------
# kernels
# ---------------------------------------------------------------------------
def _fused_kernel(meta_ref, par_ref, x_ref, out_ref, feat_ref, *,
                  total_lanes, strip):
    """Single-block path: GRU -> global GraphNorm stats -> apply, all in VMEM."""
    n = meta_ref[0]
    gru_p = _load_gru_params(par_ref)
    n_strips = total_lanes // strip

    def gru_body(i, carry):
        off = pl.multiple_of(i * strip, strip)
        mask = _strip_mask(off, strip, total_lanes, n)
        _gru_strip(gru_p, x_ref, feat_ref, off, strip, mask)
        return carry

    lax.fori_loop(0, n_strips, gru_body, 0)

    # GraphNorm finalize (features are required post-stats, so they live in
    # VMEM scratch; the stats read below is a cheap VMEM-only pass).
    inv_n = 1.0 / n.astype(jnp.float32)
    a, b = [], []
    for k in range(FEAT_OUT):
        s = jnp.float32(0.0)
        q = jnp.float32(0.0)
        for c0 in range(0, total_lanes, 2048):        # chunked: bounds vregs
            cw = min(2048, total_lanes - c0)
            f = feat_ref[SUB * k:SUB * (k + 1), c0:c0 + cw]
            s = s + jnp.sum(f)
            q = q + jnp.sum(f * f)
        m = s * inv_n
        ex2 = q * inv_n
        gw = par_ref[P_GN_W + k]
        gb = par_ref[P_GN_B + k]
        ms = par_ref[P_GN_MS + k]
        # E[(f - ms*m)^2] = E[f^2] - (2*ms - ms^2) * m^2 ; clamp for stability.
        var = jnp.maximum(ex2 - (2.0 * ms - ms * ms) * m * m, 0.0)
        inv_std = lax.rsqrt(var + GN_EPS)
        a.append(gw * inv_std)
        b.append(gb - gw * inv_std * ms * m)
    w = [par_ref[P_FC_W + k] for k in range(FEAT_OUT)]
    bias = par_ref[P_FC_B]

    def apply_body(i, carry):
        off = pl.multiple_of(i * strip, strip)
        _apply_strip(feat_ref, out_ref, off, strip, a, b, w, bias)
        return carry

    lax.fori_loop(0, n_strips, apply_body, 0)


def _feat_stats_kernel(meta_ref, par_ref, x_ref, feat_ref, pstats_ref, *,
                       total_lanes, block_lanes, strip):
    """Multi-tile pass 1: GRU features (written once) + per-tile partial stats."""
    j = pl.program_id(0)
    n = meta_ref[0]
    gru_p = _load_gru_params(par_ref)
    n_strips = block_lanes // strip

    def gru_body(i, carry):
        off = pl.multiple_of(i * strip, strip)
        mask = _strip_mask(j * block_lanes + off, strip, total_lanes, n)
        _gru_strip(gru_p, x_ref, feat_ref, off, strip, mask)
        return carry

    lax.fori_loop(0, n_strips, gru_body, 0)

    # Per-tile partial sums / sums-of-squares (padded nodes already zeroed).
    # Sublane / tile folding happens in the wrapper on a tiny array.
    for k in range(FEAT_OUT):
        f = feat_ref[SUB * k:SUB * (k + 1), :]
        pstats_ref[SUB * k:SUB * (k + 1), 0:1] = jnp.sum(f, axis=1, keepdims=True)
        pstats_ref[SUB * k:SUB * (k + 1), 1:2] = jnp.sum(f * f, axis=1,
                                                         keepdims=True)


def _apply_kernel(app_ref, feat_ref, out_ref, *, block_lanes, strip):
    """Multi-tile pass 2: affine + leaky_relu + 9->1 linear (no GRU recompute)."""
    a = [app_ref[k] for k in range(FEAT_OUT)]
    b = [app_ref[FEAT_OUT + k] for k in range(FEAT_OUT)]
    w = [app_ref[2 * FEAT_OUT + k] for k in range(FEAT_OUT)]
    bias = app_ref[3 * FEAT_OUT]
    n_strips = block_lanes // strip

    def body(i, carry):
        off = pl.multiple_of(i * strip, strip)
        _apply_strip(feat_ref, out_ref, off, strip, a, b, w, bias)
        return carry

    lax.fori_loop(0, n_strips, body, 0)


# ---------------------------------------------------------------------------
# wrapper
# ---------------------------------------------------------------------------
def _pack_x(x, total_lanes):
    """[N, 5] -> [40, total_lanes]: one 8-sublane slab per input feature."""
    n = x.shape[0]
    n_pad = SUB * total_lanes
    xt = jnp.zeros((NODE_FEATURES, n_pad), jnp.float32)
    xt = xt.at[:, :n].set(jnp.asarray(x, jnp.float32).T)
    return xt.reshape(X_ROWS, total_lanes)


def grus_forward(x, packed_params, *, block_lanes=2048, strip=256,
                 max_fused_lanes=8192):
    """x: [N, NODE_FEATURES] f32; packed_params: [PAR_LEN] f32. Returns [N, 1]."""
    assert packed_params.shape == (PAR_LEN,)
    assert block_lanes % 128 == 0 and strip % 128 == 0
    n = int(x.shape[0])
    lanes_needed = max((n + SUB - 1) // SUB, 1)

    smem_spec = pl.BlockSpec(memory_space=pltpu.MemorySpace.SMEM)
    meta = jnp.array([n], jnp.int32)
    par = packed_params.astype(jnp.float32)

    if lanes_needed <= max_fused_lanes:
        # ---- fused single-block path: no HBM intermediates, x read once.
        lanes = max(128, _next_pow2(lanes_needed))     # bucketed -> few recompiles
        sw = min(strip, lanes)
        xp = _pack_x(x, lanes)
        out = pl.pallas_call(
            functools.partial(_fused_kernel, total_lanes=lanes, strip=sw),
            out_shape=jax.ShapeDtypeStruct((SUB, lanes), jnp.float32),
            grid_spec=pltpu.PrefetchScalarGridSpec(
                num_scalar_prefetch=0,
                grid=(1,),
                in_specs=[smem_spec, smem_spec,
                          pl.BlockSpec((X_ROWS, lanes), lambda i: (0, 0))],
                out_specs=pl.BlockSpec((SUB, lanes), lambda i: (0, 0)),
                scratch_shapes=[pltpu.VMEM((F_ROWS, lanes), jnp.float32)]),
            compiler_params=pltpu.CompilerParams(
                dimension_semantics=("arbitrary",)),
        )(meta, par, xp)
        return out.reshape(SUB * lanes)[:n].reshape(n, 1)

    # ---- multi-tile path: GRU runs once (pass 1), pass 2 is affine+fc only.
    lanes = _round_up(lanes_needed, block_lanes)
    num_tiles = lanes // block_lanes
    sw = min(strip, block_lanes)
    assert block_lanes % sw == 0
    xp = _pack_x(x, lanes)

    feat, pstats = pl.pallas_call(
        functools.partial(_feat_stats_kernel, total_lanes=lanes,
                          block_lanes=block_lanes, strip=sw),
        out_shape=(jax.ShapeDtypeStruct((F_ROWS, lanes), jnp.float32),
                   jax.ShapeDtypeStruct((num_tiles * F_ROWS, 2), jnp.float32)),
        grid_spec=pltpu.PrefetchScalarGridSpec(
            num_scalar_prefetch=0,
            grid=(num_tiles,),
            in_specs=[smem_spec, smem_spec,
                      pl.BlockSpec((X_ROWS, block_lanes), lambda j: (0, j))],
            out_specs=(pl.BlockSpec((F_ROWS, block_lanes), lambda j: (0, j)),
                       pl.BlockSpec((F_ROWS, 2), lambda j: (j, 0)))),
        compiler_params=pltpu.CompilerParams(
            dimension_semantics=("parallel",)),
    )(meta, par, xp)

    # Fold per-tile / per-sublane partials and finalize GraphNorm (tiny, XLA).
    st = pstats.reshape(num_tiles, FEAT_OUT, SUB, 2).sum(axis=(0, 2))   # [9, 2]
    sums, sqs = st[:, 0], st[:, 1]
    gn_w = par[P_GN_W:P_GN_W + FEAT_OUT]
    gn_b = par[P_GN_B:P_GN_B + FEAT_OUT]
    gn_ms = par[P_GN_MS:P_GN_MS + FEAT_OUT]
    fc_w = par[P_FC_W:P_FC_W + FEAT_OUT]
    fc_b = par[P_FC_B:P_FC_B + 1]
    inv_n = 1.0 / float(n)
    mean = sums * inv_n
    ex2 = sqs * inv_n
    var = jnp.maximum(ex2 - (2.0 * gn_ms - gn_ms * gn_ms) * mean * mean, 0.0)
    inv_std = jax.lax.rsqrt(var + GN_EPS)
    a = gn_w * inv_std
    b = gn_b - gn_w * inv_std * gn_ms * mean
    app = jnp.concatenate([a, b, fc_w, fc_b]).astype(jnp.float32)

    out = pl.pallas_call(
        functools.partial(_apply_kernel, block_lanes=block_lanes, strip=sw),
        out_shape=jax.ShapeDtypeStruct((SUB, lanes), jnp.float32),
        grid_spec=pltpu.PrefetchScalarGridSpec(
            num_scalar_prefetch=0,
            grid=(num_tiles,),
            in_specs=[smem_spec,
                      pl.BlockSpec((F_ROWS, block_lanes), lambda j: (0, j))],
            out_specs=pl.BlockSpec((SUB, block_lanes), lambda j: (0, j))),
        compiler_params=pltpu.CompilerParams(
            dimension_semantics=("parallel",)),
    )(app, feat)

    return out.reshape(SUB * lanes)[:n].reshape(n, 1)


# ---------------------------------------------------------------------------
# parameters + pure-JAX reference (PyTorch semantics)
# ---------------------------------------------------------------------------
def make_params(key):
    """PyTorch-layout parameters (GRU gate order: r, z, n)."""
    ks = jax.random.split(key, 6)
    bg = 1.0 / math.sqrt(HIDDEN)
    w_ih = jax.random.uniform(ks[0], (3 * HIDDEN, 1), jnp.float32, -bg, bg)
    w_hh = jax.random.uniform(ks[1], (3 * HIDDEN, HIDDEN), jnp.float32, -bg, bg)
    b_ih = jax.random.uniform(ks[2], (3 * HIDDEN,), jnp.float32, -bg, bg)
    b_hh = jax.random.uniform(ks[3], (3 * HIDDEN,), jnp.float32, -bg, bg)
    bf = 1.0 / math.sqrt(FEAT_OUT)
    fc_w = jax.random.uniform(ks[4], (1, FEAT_OUT), jnp.float32, -bf, bf)
    fc_b = jax.random.uniform(ks[5], (1,), jnp.float32, -bf, bf)
    gn_w = jnp.ones((FEAT_OUT,), jnp.float32)     # GraphNorm defaults
    gn_b = jnp.zeros((FEAT_OUT,), jnp.float32)
    gn_ms = jnp.ones((FEAT_OUT,), jnp.float32)
    return (w_ih, w_hh, b_ih, b_hh, gn_w, gn_b, gn_ms, fc_w, fc_b)


def pack_params(raw):
    w_ih, w_hh, b_ih, b_hh, gn_w, gn_b, gn_ms, fc_w, fc_b = raw
    return jnp.concatenate([
        w_ih[:, 0], w_hh.reshape(-1), b_ih, b_hh,
        gn_w, gn_b, gn_ms, fc_w[0, :], fc_b]).astype(jnp.float32)


def reference_forward(x, raw):
    """Pure-JAX, node-major reference matching the PyTorch module."""
    w_ih, w_hh, b_ih, b_hh, gn_w, gn_b, gn_ms, fc_w, fc_b = raw
    x = x.astype(jnp.float32)
    n = x.shape[0]
    h = jnp.zeros((n, HIDDEN), jnp.float32)
    outs = []
    for t in range(SEQ_LEN):
        xt = x[:, t:t + 1]
        gi = xt @ w_ih.T + b_ih
        gh = h @ w_hh.T + b_hh
        r = jax.nn.sigmoid(gi[:, 0:HIDDEN] + gh[:, 0:HIDDEN])
        z = jax.nn.sigmoid(gi[:, HIDDEN:2 * HIDDEN] + gh[:, HIDDEN:2 * HIDDEN])
        ng = jnp.tanh(gi[:, 2 * HIDDEN:3 * HIDDEN]
                      + r * gh[:, 2 * HIDDEN:3 * HIDDEN])
        h = (1.0 - z) * ng + z * h
        outs.append(h)
    feat = jnp.concatenate(outs + [x[:, -1:]], axis=1)            # [N, 9]
    mean = jnp.mean(feat, axis=0, keepdims=True)
    centered = feat - gn_ms * mean
    var = jnp.mean(centered * centered, axis=0, keepdims=True)
    normed = gn_w * centered * jax.lax.rsqrt(var + GN_EPS) + gn_b
    act = jnp.where(normed > 0, normed, LEAKY_SLOPE * normed)
    return act @ fc_w.T + fc_b


if __name__ == "__main__":
    # TODO(synk): edge_index / edge_weight are accepted by the PyTorch forward
    # but never used, so they are not modeled here.
    key = jax.random.PRNGKey(0)
    k1, k2, k3, kp = jax.random.split(key, 4)

    raw = make_params(kp)
    packed = pack_params(raw)

    # 1) tiny graph -> fused single-block path (128 lanes, 1 strip).
    n1 = 64
    x1 = jax.random.normal(k1, (n1, NODE_FEATURES), jnp.float32)
    out1 = jax.block_until_ready(grus_forward(x1, packed))
    np.testing.assert_allclose(np.asarray(out1),
                               np.asarray(reference_forward(x1, raw)),
                               rtol=1e-4, atol=1e-4)
    assert out1.shape == (n1, 1)

    # 2) 1000 nodes -> fused path, exercises padded-node masking.
    n2 = 1000
    x2 = jax.random.normal(k2, (n2, NODE_FEATURES), jnp.float32)
    out2 = jax.block_until_ready(grus_forward(x2, packed))
    np.testing.assert_allclose(np.asarray(out2),
                               np.asarray(reference_forward(x2, raw)),
                               rtol=1e-4, atol=1e-4)
    assert out2.shape == (n2, 1)

    # 3) 4000 nodes -> fused path with multiple 256-lane strips.
    n3 = 4000
    x3 = jax.random.normal(k3, (n3, NODE_FEATURES), jnp.float32)
    ref3 = np.asarray(reference_forward(x3, raw))
    out3 = jax.block_until_ready(grus_forward(x3, packed))
    np.testing.assert_allclose(np.asarray(out3), ref3, rtol=1e-4, atol=1e-4)
    assert out3.shape == (n3, 1)

    # 4) same input, forced small tiles -> multi-tile two-pass path
    #    (2 tiles x 2 strips, per-tile partial stats, feature writeback).
    out4 = jax.block_until_ready(
        grus_forward(x3, packed, block_lanes=256, strip=128,
                     max_fused_lanes=128))
    np.testing.assert_allclose(np.asarray(out4), ref3, rtol=1e-4, atol=1e-4)
    assert out4.shape == (n3, 1)

    print("KERNEL_OK")
</pallas_src>

<mosaic_0001>
module attributes {stable_mosaic.version = 11 : i64} {
  func.func @_fused_kernel(%arg0: i32, %arg1: memref<1xi32, #tpu.memory_space<smem>>, %arg2: memref<67xf32, #tpu.memory_space<smem>>, %arg3: memref<40x128xf32, #tpu.memory_space<vmem>>, %arg4: memref<8x128xf32, #tpu.memory_space<vmem>>, %arg5: memref<72x128xf32, #tpu.memory_space<vmem>>) attributes {dimension_semantics = [#tpu.dimension_semantics<arbitrary>], iteration_bounds = array<i64: 1>, scalar_prefetch = 0 : i64, scratch_operands = 1 : i64, tpu.core_type = #tpu.core_type<tc>, window_params = [{transform_indices = @transform_0, window_bounds = array<i64: 1>}, {transform_indices = @transform_1, window_bounds = array<i64: 67>}, {pipeline_mode = #tpu.pipeline_mode<synchronous>, transform_indices = @transform_2, window_bounds = array<i64: 40, 128>}, {pipeline_mode = #tpu.pipeline_mode<synchronous>, transform_indices = @transform_3, window_bounds = array<i64: 8, 128>}]} {
    %c0 = arith.constant 0 : index
    %0 = memref.load %arg1[%c0] : memref<1xi32, #tpu.memory_space<smem>>
    %c0_0 = arith.constant 0 : index
    %1 = memref.load %arg2[%c0_0] : memref<67xf32, #tpu.memory_space<smem>>
    %c1 = arith.constant 1 : index
    %2 = memref.load %arg2[%c1] : memref<67xf32, #tpu.memory_space<smem>>
    %c2 = arith.constant 2 : index
    %3 = memref.load %arg2[%c2] : memref<67xf32, #tpu.memory_space<smem>>
    %c3 = arith.constant 3 : index
    %4 = memref.load %arg2[%c3] : memref<67xf32, #tpu.memory_space<smem>>
    %c4 = arith.constant 4 : index
    %5 = memref.load %arg2[%c4] : memref<67xf32, #tpu.memory_space<smem>>
    %c5 = arith.constant 5 : index
    %6 = memref.load %arg2[%c5] : memref<67xf32, #tpu.memory_space<smem>>
    %c6 = arith.constant 6 : index
    %7 = memref.load %arg2[%c6] : memref<67xf32, #tpu.memory_space<smem>>
    %c7 = arith.constant 7 : index
    %8 = memref.load %arg2[%c7] : memref<67xf32, #tpu.memory_space<smem>>
    %c8 = arith.constant 8 : index
    %9 = memref.load %arg2[%c8] : memref<67xf32, #tpu.memory_space<smem>>
    %c9 = arith.constant 9 : index
    %10 = memref.load %arg2[%c9] : memref<67xf32, #tpu.memory_space<smem>>
    %c10 = arith.constant 10 : index
    %11 = memref.load %arg2[%c10] : memref<67xf32, #tpu.memory_space<smem>>
    %c11 = arith.constant 11 : index
    %12 = memref.load %arg2[%c11] : memref<67xf32, #tpu.memory_space<smem>>
    %c12 = arith.constant 12 : index
    %13 = memref.load %arg2[%c12] : memref<67xf32, #tpu.memory_space<smem>>
    %c13 = arith.constant 13 : index
    %14 = memref.load %arg2[%c13] : memref<67xf32, #tpu.memory_space<smem>>
    %c14 = arith.constant 14 : index
    %15 = memref.load %arg2[%c14] : memref<67xf32, #tpu.memory_space<smem>>
    %c15 = arith.constant 15 : index
    %16 = memref.load %arg2[%c15] : memref<67xf32, #tpu.memory_space<smem>>
    %c16 = arith.constant 16 : index
    %17 = memref.load %arg2[%c16] : memref<67xf32, #tpu.memory_space<smem>>
    %c17 = arith.constant 17 : index
    %18 = memref.load %arg2[%c17] : memref<67xf32, #tpu.memory_space<smem>>
    %c18 = arith.constant 18 : index
    %19 = memref.load %arg2[%c18] : memref<67xf32, #tpu.memory_space<smem>>
    %c19 = arith.constant 19 : index
    %20 = memref.load %arg2[%c19] : memref<67xf32, #tpu.memory_space<smem>>
    %c20 = arith.constant 20 : index
    %21 = memref.load %arg2[%c20] : memref<67xf32, #tpu.memory_space<smem>>
    %c21 = arith.constant 21 : index
    %22 = memref.load %arg2[%c21] : memref<67xf32, #tpu.memory_space<smem>>
    %c22 = arith.constant 22 : index
    %23 = memref.load %arg2[%c22] : memref<67xf32, #tpu.memory_space<smem>>
    %c23 = arith.constant 23 : index
    %24 = memref.load %arg2[%c23] : memref<67xf32, #tpu.memory_space<smem>>
    %c24 = arith.constant 24 : index
    %25 = memref.load %arg2[%c24] : memref<67xf32, #tpu.memory_space<smem>>
    %c25 = arith.constant 25 : index
    %26 = memref.load %arg2[%c25] : memref<67xf32, #tpu.memory_space<smem>>
    %c26 = arith.constant 26 : index
    %27 = memref.load %arg2[%c26] : memref<67xf32, #tpu.memory_space<smem>>
    %c27 = arith.constant 27 : index
    %28 = memref.load %arg2[%c27] : memref<67xf32, #tpu.memory_space<smem>>
    %c28 = arith.constant 28 : index
    %29 = memref.load %arg2[%c28] : memref<67xf32, #tpu.memory_space<smem>>
    %c29 = arith.constant 29 : index
    %30 = memref.load %arg2[%c29] : memref<67xf32, #tpu.memory_space<smem>>
    %c0_i32 = arith.constant 0 : i32
    %c128_i32 = arith.constant 128 : i32
    %31 = arith.muli %c0_i32, %c128_i32 : i32
    %32 = tpu.assume_multiple %31, 128 : i32
    %33 = tpu.iota {dimensions = array<i32: 0>} : vector<8x128xi32>
    %34 = tpu.iota {dimensions = array<i32: 1>} : vector<8x128xi32>
    %c128_i32_1 = arith.constant 128 : i32
    %35 = vector.broadcast %c128_i32_1 : i32 to vector<8x128xi32>
    %36 = arith.muli %33, %35 : vector<8x128xi32>
    %37 = vector.broadcast %32 : i32 to vector<8x128xi32>
    %38 = arith.addi %36, %37 : vector<8x128xi32>
    %39 = arith.addi %38, %34 : vector<8x128xi32>
    %40 = vector.broadcast %0 : i32 to vector<8x128xi32>
    %41 = arith.cmpi slt, %39, %40 : vector<8x128xi32>
    %42 = arith.extui %41 : vector<8x128xi1> to vector<8x128xi32>
    %43 = arith.sitofp %42 : vector<8x128xi32> to vector<8x128xf32>
    %cst = arith.constant 0.000000e+00 : f32
    %44 = vector.broadcast %cst : f32 to vector<8x128xf32>
    %cst_2 = arith.constant 0.000000e+00 : f32
    %45 = vector.broadcast %cst_2 : f32 to vector<8x128xf32>
    %c0_3 = arith.constant 0 : index
    %46 = arith.index_cast %32 : i32 to index
    %47 = vector.load %arg3[%c0_3, %46] : memref<40x128xf32, #tpu.memory_space<vmem>>, vector<8x128xf32>
    %48 = vector.broadcast %7 : f32 to vector<8x128xf32>
    %49 = arith.mulf %48, %44 : vector<8x128xf32>
    %50 = vector.broadcast %8 : f32 to vector<8x128xf32>
    %51 = arith.mulf %50, %45 : vector<8x128xf32>
    %52 = arith.addf %49, %51 : vector<8x128xf32>
    %53 = vector.broadcast %25 : f32 to vector<8x128xf32>
    %54 = arith.addf %52, %53 : vector<8x128xf32>
    %55 = vector.broadcast %11 : f32 to vector<8x128xf32>
    %56 = arith.mulf %55, %44 : vector<8x128xf32>
    %57 = vector.broadcast %12 : f32 to vector<8x128xf32>
    %58 = arith.mulf %57, %45 : vector<8x128xf32>
    %59 = arith.addf %56, %58 : vector<8x128xf32>
    %60 = vector.broadcast %27 : f32 to vector<8x128xf32>
    %61 = arith.addf %59, %60 : vector<8x128xf32>
    %62 = vector.broadcast %15 : f32 to vector<8x128xf32>
    %63 = arith.mulf %62, %44 : vector<8x128xf32>
    %64 = vector.broadcast %16 : f32 to vector<8x128xf32>
    %65 = arith.mulf %64, %45 : vector<8x128xf32>
    %66 = arith.addf %63, %65 : vector<8x128xf32>
    %67 = vector.broadcast %29 : f32 to vector<8x128xf32>
    %68 = arith.addf %66, %67 : vector<8x128xf32>
    %69 = vector.broadcast %1 : f32 to vector<8x128xf32>
    %70 = arith.mulf %69, %47 : vector<8x128xf32>
    %71 = vector.broadcast %19 : f32 to vector<8x128xf32>
    %72 = arith.addf %70, %71 : vector<8x128xf32>
    %73 = arith.addf %72, %54 : vector<8x128xf32>
    %74 = arith.negf %73 : vector<8x128xf32>
    %75 = math.exp %74 : vector<8x128xf32>
    %cst_4 = arith.constant 1.000000e+00 : f32
    %76 = vector.broadcast %cst_4 : f32 to vector<8x128xf32>
    %77 = arith.addf %76, %75 : vector<8x128xf32>
    %78 = arith.divf %76, %77 : vector<8x128xf32>
    %79 = vector.broadcast %3 : f32 to vector<8x128xf32>
    %80 = arith.mulf %79, %47 : vector<8x128xf32>
    %81 = vector.broadcast %21 : f32 to vector<8x128xf32>
    %82 = arith.addf %80, %81 : vector<8x128xf32>
    %83 = arith.addf %82, %61 : vector<8x128xf32>
    %84 = arith.negf %83 : vector<8x128xf32>
    %85 = math.exp %84 : vector<8x128xf32>
    %cst_5 = arith.constant 1.000000e+00 : f32
    %86 = vector.broadcast %cst_5 : f32 to vector<8x128xf32>
    %87 = arith.addf %86, %85 : vector<8x128xf32>
    %88 = arith.divf %86, %87 : vector<8x128xf32>
    %89 = vector.broadcast %9 : f32 to vector<8x128xf32>
    %90 = arith.mulf %89, %44 : vector<8x128xf32>
    %91 = vector.broadcast %10 : f32 to vector<8x128xf32>
    %92 = arith.mulf %91, %45 : vector<8x128xf32>
    %93 = arith.addf %90, %92 : vector<8x128xf32>
    %94 = vector.broadcast %26 : f32 to vector<8x128xf32>
    %95 = arith.addf %93, %94 : vector<8x128xf32>
    %96 = vector.broadcast %13 : f32 to vector<8x128xf32>
    %97 = arith.mulf %96, %44 : vector<8x128xf32>
    %98 = vector.broadcast %14 : f32 to vector<8x128xf32>
    %99 = arith.mulf %98, %45 : vector<8x128xf32>
    %100 = arith.addf %97, %99 : vector<8x128xf32>
    %101 = vector.broadcast %28 : f32 to vector<8x128xf32>
    %102 = arith.addf %100, %101 : vector<8x128xf32>
    %103 = vector.broadcast %17 : f32 to vector<8x128xf32>
    %104 = arith.mulf %103, %44 : vector<8x128xf32>
    %105 = vector.broadcast %18 : f32 to vector<8x128xf32>
    %106 = arith.mulf %105, %45 : vector<8x128xf32>
    %107 = arith.addf %104, %106 : vector<8x128xf32>
    %108 = vector.broadcast %30 : f32 to vector<8x128xf32>
    %109 = arith.addf %107, %108 : vector<8x128xf32>
    %110 = vector.broadcast %2 : f32 to vector<8x128xf32>
    %111 = arith.mulf %110, %47 : vector<8x128xf32>
    %112 = vector.broadcast %20 : f32 to vector<8x128xf32>
    %113 = arith.addf %111, %112 : vector<8x128xf32>
    %114 = arith.addf %113, %95 : vector<8x128xf32>
    %115 = arith.negf %114 : vector<8x128xf32>
    %116 = math.exp %115 : vector<8x128xf32>
    %cst_6 = arith.constant 1.000000e+00 : f32
    %117 = vector.broadcast %cst_6 : f32 to vector<8x128xf32>
    %118 = arith.addf %117, %116 : vector<8x128xf32>
    %119 = arith.divf %117, %118 : vector<8x128xf32>
    %120 = vector.broadcast %4 : f32 to vector<8x128xf32>
    %121 = arith.mulf %120, %47 : vector<8x128xf32>
    %122 = vector.broadcast %22 : f32 to vector<8x128xf32>
    %123 = arith.addf %121, %122 : vector<8x128xf32>
    %124 = arith.addf %123, %102 : vector<8x128xf32>
    %125 = arith.negf %124 : vector<8x128xf32>
    %126 = math.exp %125 : vector<8x128xf32>
    %cst_7 = arith.constant 1.000000e+00 : f32
    %127 = vector.broadcast %cst_7 : f32 to vector<8x128xf32>
    %128 = arith.addf %127, %126 : vector<8x128xf32>
    %129 = arith.divf %127, %128 : vector<8x128xf32>
    %130 = vector.broadcast %5 : f32 to vector<8x128xf32>
    %131 = arith.mulf %130, %47 : vector<8x128xf32>
    %132 = vector.broadcast %23 : f32 to vector<8x128xf32>
    %133 = arith.addf %131, %132 : vector<8x128xf32>
    %134 = arith.mulf %78, %68 : vector<8x128xf32>
    %135 = arith.addf %133, %134 : vector<8x128xf32>
    %136 = math.tanh %135 : vector<8x128xf32>
    %cst_8 = arith.constant 1.000000e+00 : f32
    %137 = vector.broadcast %cst_8 : f32 to vector<8x128xf32>
    %138 = arith.subf %137, %88 : vector<8x128xf32>
    %139 = arith.mulf %138, %136 : vector<8x128xf32>
    %140 = arith.mulf %88, %44 : vector<8x128xf32>
    %141 = arith.addf %139, %140 : vector<8x128xf32>
    %142 = arith.mulf %141, %43 : vector<8x128xf32>
    %c0_9 = arith.constant 0 : index
    %143 = arith.index_cast %32 : i32 to index
    %144 = vector.load %arg5[%c0_9, %143] : memref<72x128xf32, #tpu.memory_space<vmem>>, vector<8x128xf32>
    tpu.vector_store %arg5[%c0_9, %143], %142 {strides = array<i32>} : memref<72x128xf32, #tpu.memory_space<vmem>>, vector<8x128xf32>,
    %145 = vector.broadcast %6 : f32 to vector<8x128xf32>
    %146 = arith.mulf %145, %47 : vector<8x128xf32>
    %147 = vector.broadcast %24 : f32 to vector<8x128xf32>
    %148 = arith.addf %146, %147 : vector<8x128xf32>
    %149 = arith.mulf %119, %109 : vector<8x128xf32>
    %150 = arith.addf %148, %149 : vector<8x128xf32>
    %151 = math.tanh %150 : vector<8x128xf32>
    %cst_10 = arith.constant 1.000000e+00 : f32
    %152 = vector.broadcast %cst_10 : f32 to vector<8x128xf32>
    %153 = arith.subf %152, %129 : vector<8x128xf32>
    %154 = arith.mulf %153, %151 : vector<8x128xf32>
    %155 = arith.mulf %129, %45 : vector<8x128xf32>
    %156 = arith.addf %154, %155 : vector<8x128xf32>
    %157 = arith.mulf %156, %43 : vector<8x128xf32>
    %c8_11 = arith.constant 8 : index
    %158 = arith.index_cast %32 : i32 to index
    %159 = vector.load %arg5[%c8_11, %158] : memref<72x128xf32, #tpu.memory_space<vmem>>, vector<8x128xf32>
    tpu.vector_store %arg5[%c8_11, %158], %157 {strides = array<i32>} : memref<72x128xf32, #tpu.memory_space<vmem>>, vector<8x128xf32>,
    %c8_12 = arith.constant 8 : index
    %160 = arith.index_cast %32 : i32 to index
    %161 = vector.load %arg3[%c8_12, %160] : memref<40x128xf32, #tpu.memory_space<vmem>>, vector<8x128xf32>
    %162 = vector.broadcast %7 : f32 to vector<8x128xf32>
    %163 = arith.mulf %162, %141 : vector<8x128xf32>
    %164 = vector.broadcast %8 : f32 to vector<8x128xf32>
    %165 = arith.mulf %164, %156 : vector<8x128xf32>
    %166 = arith.addf %163, %165 : vector<8x128xf32>
    %167 = vector.broadcast %25 : f32 to vector<8x128xf32>
    %168 = arith.addf %166, %167 : vector<8x128xf32>
    %169 = vector.broadcast %11 : f32 to vector<8x128xf32>
    %170 = arith.mulf %169, %141 : vector<8x128xf32>
    %171 = vector.broadcast %12 : f32 to vector<8x128xf32>
    %172 = arith.mulf %171, %156 : vector<8x128xf32>
    %173 = arith.addf %170, %172 : vector<8x128xf32>
    %174 = vector.broadcast %27 : f32 to vector<8x128xf32>
    %175 = arith.addf %173, %174 : vector<8x128xf32>
    %176 = vector.broadcast %15 : f32 to vector<8x128xf32>
    %177 = arith.mulf %176, %141 : vector<8x128xf32>
    %178 = vector.broadcast %16 : f32 to vector<8x128xf32>
    %179 = arith.mulf %178, %156 : vector<8x128xf32>
    %180 = arith.addf %177, %179 : vector<8x128xf32>
    %181 = vector.broadcast %29 : f32 to vector<8x128xf32>
    %182 = arith.addf %180, %181 : vector<8x128xf32>
    %183 = vector.broadcast %1 : f32 to vector<8x128xf32>
    %184 = arith.mulf %183, %161 : vector<8x128xf32>
    %185 = vector.broadcast %19 : f32 to vector<8x128xf32>
    %186 = arith.addf %184, %185 : vector<8x128xf32>
    %187 = arith.addf %186, %168 : vector<8x128xf32>
    %188 = arith.negf %187 : vector<8x128xf32>
    %189 = math.exp %188 : vector<8x128xf32>
    %cst_13 = arith.constant 1.000000e+00 : f32
    %190 = vector.broadcast %cst_13 : f32 to vector<8x128xf32>
    %191 = arith.addf %190, %189 : vector<8x128xf32>
    %192 = arith.divf %190, %191 : vector<8x128xf32>
    %193 = vector.broadcast %3 : f32 to vector<8x128xf32>
    %194 = arith.mulf %193, %161 : vector<8x128xf32>
    %195 = vector.broadcast %21 : f32 to vector<8x128xf32>
    %196 = arith.addf %194, %195 : vector<8x128xf32>
    %197 = arith.addf %196, %175 : vector<8x128xf32>
    %198 = arith.negf %197 : vector<8x128xf32>
    %199 = math.exp %198 : vector<8x128xf32>
    %cst_14 = arith.constant 1.000000e+00 : f32
    %200 = vector.broadcast %cst_14 : f32 to vector<8x128xf32>
    %201 = arith.addf %200, %199 : vector<8x128xf32>
    %202 = arith.divf %200, %201 : vector<8x128xf32>
    %203 = vector.broadcast %9 : f32 to vector<8x128xf32>
    %204 = arith.mulf %203, %141 : vector<8x128xf32>
    %205 = vector.broadcast %10 : f32 to vector<8x128xf32>
    %206 = arith.mulf %205, %156 : vector<8x128xf32>
    %207 = arith.addf %204, %206 : vector<8x128xf32>
    %208 = vector.broadcast %26 : f32 to vector<8x128xf32>
    %209 = arith.addf %207, %208 : vector<8x128xf32>
    %210 = vector.broadcast %13 : f32 to vector<8x128xf32>
    %211 = arith.mulf %210, %141 : vector<8x128xf32>
    %212 = vector.broadcast %14 : f32 to vector<8x128xf32>
    %213 = arith.mulf %212, %156 : vector<8x128xf32>
    %214 = arith.addf %211, %213 : vector<8x128xf32>
    %215 = vector.broadcast %28 : f32 to vector<8x128xf32>
    %216 = arith.addf %214, %215 : vector<8x128xf32>
    %217 = vector.broadcast %17 : f32 to vector<8x128xf32>
    %218 = arith.mulf %217, %141 : vector<8x128xf32>
    %219 = vector.broadcast %18 : f32 to vector<8x128xf32>
    %220 = arith.mulf %219, %156 : vector<8x128xf32>
    %221 = arith.addf %218, %220 : vector<8x128xf32>
    %222 = vector.broadcast %30 : f32 to vector<8x128xf32>
    %223 = arith.addf %221, %222 : vector<8x128xf32>
    %224 = vector.broadcast %2 : f32 to vector<8x128xf32>
    %225 = arith.mulf %224, %161 : vector<8x128xf32>
    %226 = vector.broadcast %20 : f32 to vector<8x128xf32>
    %227 = arith.addf %225, %226 : vector<8x128xf32>
    %228 = arith.addf %227, %209 : vector<8x128xf32>
    %229 = arith.negf %228 : vector<8x128xf32>
    %230 = math.exp %229 : vector<8x128xf32>
    %cst_15 = arith.constant 1.000000e+00 : f32
    %231 = vector.broadcast %cst_15 : f32 to vector<8x128xf32>
    %232 = arith.addf %231, %230 : vector<8x128xf32>
    %233 = arith.divf %231, %232 : vector<8x128xf32>
    %234 = vector.broadcast %4 : f32 to vector<8x128xf32>
    %235 = arith.mulf %234, %161 : vector<8x128xf32>
    %236 = vector.broadcast %22 : f32 to vector<8x128xf32>
    %237 = arith.addf %235, %236 : vector<8x128xf32>
    %238 = arith.addf %237, %216 : vector<8x128xf32>
    %239 = arith.negf %238 : vector<8x128xf32>
    %240 = math.exp %239 : vector<8x128xf32>
    %cst_16 = arith.constant 1.000000e+00 : f32
    %241 = vector.broadcast %cst_16 : f32 to vector<8x128xf32>
    %242 = arith.addf %241, %240 : vector<8x128xf32>
    %243 = arith.divf %241, %242 : vector<8x128xf32>
    %244 = vector.broadcast %5 : f32 to vector<8x128xf32>
    %245 = arith.mulf %244, %161 : vector<8x128xf32>
    %246 = vector.broadcast %23 : f32 to vector<8x128xf32>
    %247 = arith.addf %245, %246 : vector<8x128xf32>
    %248 = arith.mulf %192, %182 : vector<8x128xf32>
    %249 = arith.addf %247, %248 : vector<8x128xf32>
    %250 = math.tanh %249 : vector<8x128xf32>
    %cst_17 = arith.constant 1.000000e+00 : f32
    %251 = vector.broadcast %cst_17 : f32 to vector<8x128xf32>
    %252 = arith.subf %251, %202 : vector<8x128xf32>
    %253 = arith.mulf %252, %250 : vector<8x128xf32>
    %254 = arith.mulf %202, %141 : vector<8x128xf32>
    %255 = arith.addf %253, %254 : vector<8x128xf32>
    %256 = arith.mulf %255, %43 : vector<8x128xf32>
    %c16_18 = arith.constant 16 : index
    %257 = arith.index_cast %32 : i32 to index
    %258 = vector.load %arg5[%c16_18, %257] : memref<72x128xf32, #tpu.memory_space<vmem>>, vector<8x128xf32>
    tpu.vector_store %arg5[%c16_18, %257], %256 {strides = array<i32>} : memref<72x128xf32, #tpu.memory_space<vmem>>, vector<8x128xf32>,
    %259 = vector.broadcast %6 : f32 to vector<8x128xf32>
    %260 = arith.mulf %259, %161 : vector<8x128xf32>
    %261 = vector.broadcast %24 : f32 to vector<8x128xf32>
    %262 = arith.addf %260, %261 : vector<8x128xf32>
    %263 = arith.mulf %233, %223 : vector<8x128xf32>
    %264 = arith.addf %262, %263 : vector<8x128xf32>
    %265 = math.tanh %264 : vector<8x128xf32>
    %cst_19 = arith.constant 1.000000e+00 : f32
    %266 = vector.broadcast %cst_19 : f32 to vector<8x128xf32>
    %267 = arith.subf %266, %243 : vector<8x128xf32>
    %268 = arith.mulf %267, %265 : vector<8x128xf32>
    %269 = arith.mulf %243, %156 : vector<8x128xf32>
    %270 = arith.addf %268, %269 : vector<8x128xf32>
    %271 = arith.mulf %270, %43 : vector<8x128xf32>
    %c24_20 = arith.constant 24 : index
    %272 = arith.index_cast %32 : i32 to index
    %273 = vector.load %arg5[%c24_20, %272] : memref<72x128xf32, #tpu.memory_space<vmem>>, vector<8x128xf32>
    tpu.vector_store %arg5[%c24_20, %272], %271 {strides = array<i32>} : memref<72x128xf32, #tpu.memory_space<vmem>>, vector<8x128xf32>,
    %c16_21 = arith.constant 16 : index
    %274 = arith.index_cast %32 : i32 to index
    %275 = vector.load %arg3[%c16_21, %274] : memref<40x128xf32, #tpu.memory_space<vmem>>, vector<8x128xf32>
    %276 = vector.broadcast %7 : f32 to vector<8x128xf32>
    %277 = arith.mulf %276, %255 : vector<8x128xf32>
    %278 = vector.broadcast %8 : f32 to vector<8x128xf32>
    %279 = arith.mulf %278, %270 : vector<8x128xf32>
    %280 = arith.addf %277, %279 : vector<8x128xf32>
    %281 = vector.broadcast %25 : f32 to vector<8x128xf32>
    %282 = arith.addf %280, %281 : vector<8x128xf32>
    %283 = vector.broadcast %11 : f32 to vector<8x128xf32>
    %284 = arith.mulf %283, %255 : vector<8x128xf32>
    %285 = vector.broadcast %12 : f32 to vector<8x128xf32>
    %286 = arith.mulf %285, %270 : vector<8x128xf32>
    %287 = arith.addf %284, %286 : vector<8x128xf32>
    %288 = vector.broadcast %27 : f32 to vector<8x128xf32>
    %289 = arith.addf %287, %288 : vector<8x128xf32>
    %290 = vector.broadcast %15 : f32 to vector<8x128xf32>
    %291 = arith.mulf %290, %255 : vector<8x128xf32>
    %292 = vector.broadcast %16 : f32 to vector<8x128xf32>
    %293 = arith.mulf %292, %270 : vector<8x128xf32>
    %294 = arith.addf %291, %293 : vector<8x128xf32>
    %295 = vector.broadcast %29 : f32 to vector<8x128xf32>
    %296 = arith.addf %294, %295 : vector<8x128xf32>
    %297 = vector.broadcast %1 : f32 to vector<8x128xf32>
    %298 = arith.mulf %297, %275 : vector<8x128xf32>
    %299 = vector.broadcast %19 : f32 to vector<8x128xf32>
    %300 = arith.addf %298, %299 : vector<8x128xf32>
    %301 = arith.addf %300, %282 : vector<8x128xf32>
    %302 = arith.negf %301 : vector<8x128xf32>
    %303 = math.exp %302 : vector<8x128xf32>
    %cst_22 = arith.constant 1.000000e+00 : f32
    %304 = vector.broadcast %cst_22 : f32 to vector<8x128xf32>
    %305 = arith.addf %304, %303 : vector<8x128xf32>
    %306 = arith.divf %304, %305 : vector<8x128xf32>
    %307 = vector.broadcast %3 : f32 to vector<8x128xf32>
    %308 = arith.mulf %307, %275 : vector<8x128xf32>
    %309 = vector.broadcast %21 : f32 to vector<8x128xf32>
    %310 = arith.addf %308, %309 : vector<8x128xf32>
    %311 = arith.addf %310, %289 : vector<8x128xf32>
    %312 = arith.negf %311 : vector<8x128xf32>
    %313 = math.exp %312 : vector<8x128xf32>
    %cst_23 = arith.constant 1.000000e+00 : f32
    %314 = vector.broadcast %cst_23 : f32 to vector<8x128xf32>
    %315 = arith.addf %314, %313 : vector<8x128xf32>
    %316 = arith.divf %314, %315 : vector<8x128xf32>
    %317 = vector.broadcast %9 : f32 to vector<8x128xf32>
    %318 = arith.mulf %317, %255 : vector<8x128xf32>
    %319 = vector.broadcast %10 : f32 to vector<8x128xf32>
    %320 = arith.mulf %319, %270 : vector<8x128xf32>
    %321 = arith.addf %318, %320 : vector<8x128xf32>
    %322 = vector.broadcast %26 : f32 to vector<8x128xf32>
    %323 = arith.addf %321, %322 : vector<8x128xf32>
    %324 = vector.broadcast %13 : f32 to vector<8x128xf32>
    %325 = arith.mulf %324, %255 : vector<8x128xf32>
    %326 = vector.broadcast %14 : f32 to vector<8x128xf32>
    %327 = arith.mulf %326, %270 : vector<8x128xf32>
    %328 = arith.addf %325, %327 : vector<8x128xf32>
    %329 = vector.broadcast %28 : f32 to vector<8x128xf32>
    %330 = arith.addf %328, %329 : vector<8x128xf32>
    %331 = vector.broadcast %17 : f32 to vector<8x128xf32>
    %332 = arith.mulf %331, %255 : vector<8x128xf32>
    %333 = vector.broadcast %18 : f32 to vector<8x128xf32>
    %334 = arith.mulf %333, %270 : vector<8x128xf32>
    %335 = arith.addf %332, %334 : vector<8x128xf32>
    %336 = vector.broadcast %30 : f32 to vector<8x128xf32>
    %337 = arith.addf %335, %336 : vector<8x128xf32>
    %338 = vector.broadcast %2 : f32 to vector<8x128xf32>
    %339 = arith.mulf %338, %275 : vector<8x128xf32>
    %340 = vector.broadcast %20 : f32 to vector<8x128xf32>
    %341 = arith.addf %339, %340 : vector<8x128xf32>
    %342 = arith.addf %341, %323 : vector<8x128xf32>
    %343 = arith.negf %342 : vector<8x128xf32>
    %344 = math.exp %343 : vector<8x128xf32>
    %cst_24 = arith.constant 1.000000e+00 : f32
    %345 = vector.broadcast %cst_24 : f32 to vector<8x128xf32>
    %346 = arith.addf %345, %344 : vector<8x128xf32>
    %347 = arith.divf %345, %346 : vector<8x128xf32>
    %348 = vector.broadcast %4 : f32 to vector<8x128xf32>
    %349 = arith.mulf %348, %275 : vector<8x128xf32>
    %350 = vector.broadcast %22 : f32 to vector<8x128xf32>
    %351 = arith.addf %349, %350 : vector<8x128xf32>
    %352 = arith.addf %351, %330 : vector<8x128xf32>
    %353 = arith.negf %352 : vector<8x128xf32>
    %354 = math.exp %353 : vector<8x128xf32>
    %cst_25 = arith.constant 1.000000e+00 : f32
    %355 = vector.broadcast %cst_25 : f32 to vector<8x128xf32>
    %356 = arith.addf %355, %354 : vector<8x128xf32>
    %357 = arith.divf %355, %356 : vector<8x128xf32>
    %358 = vector.broadcast %5 : f32 to vector<8x128xf32>
    %359 = arith.mulf %358, %275 : vector<8x128xf32>
    %360 = vector.broadcast %23 : f32 to vector<8x128xf32>
    %361 = arith.addf %359, %360 : vector<8x128xf32>
    %362 = arith.mulf %306, %296 : vector<8x128xf32>
    %363 = arith.addf %361, %362 : vector<8x128xf32>
    %364 = math.tanh %363 : vector<8x128xf32>
    %cst_26 = arith.constant 1.000000e+00 : f32
    %365 = vector.broadcast %cst_26 : f32 to vector<8x128xf32>
    %366 = arith.subf %365, %316 : vector<8x128xf32>
    %367 = arith.mulf %366, %364 : vector<8x128xf32>
    %368 = arith.mulf %316, %255 : vector<8x128xf32>
    %369 = arith.addf %367, %368 : vector<8x128xf32>
    %370 = arith.mulf %369, %43 : vector<8x128xf32>
    %c32 = arith.constant 32 : index
    %371 = arith.index_cast %32 : i32 to index
    %372 = vector.load %arg5[%c32, %371] : memref<72x128xf32, #tpu.memory_space<vmem>>, vector<8x128xf32>
    tpu.vector_store %arg5[%c32, %371], %370 {strides = array<i32>} : memref<72x128xf32, #tpu.memory_space<vmem>>, vector<8x128xf32>,
    %373 = vector.broadcast %6 : f32 to vector<8x128xf32>
    %374 = arith.mulf %373, %275 : vector<8x128xf32>
    %375 = vector.broadcast %24 : f32 to vector<8x128xf32>
    %376 = arith.addf %374, %375 : vector<8x128xf32>
    %377 = arith.mulf %347, %337 : vector<8x128xf32>
    %378 = arith.addf %376, %377 : vector<8x128xf32>
    %379 = math.tanh %378 : vector<8x128xf32>
    %cst_27 = arith.constant 1.000000e+00 : f32
    %380 = vector.broadcast %cst_27 : f32 to vector<8x128xf32>
    %381 = arith.subf %380, %357 : vector<8x128xf32>
    %382 = arith.mulf %381, %379 : vector<8x128xf32>
    %383 = arith.mulf %357, %270 : vector<8x128xf32>
    %384 = arith.addf %382, %383 : vector<8x128xf32>
    %385 = arith.mulf %384, %43 : vector<8x128xf32>
    %c40 = arith.constant 40 : index
    %386 = arith.index_cast %32 : i32 to index
    %387 = vector.load %arg5[%c40, %386] : memref<72x128xf32, #tpu.memory_space<vmem>>, vector<8x128xf32>
    tpu.vector_store %arg5[%c40, %386], %385 {strides = array<i32>} : memref<72x128xf32, #tpu.memory_space<vmem>>, vector<8x128xf32>,
    %c24_28 = arith.constant 24 : index
    %388 = arith.index_cast %32 : i32 to index
    %389 = vector.load %arg3[%c24_28, %388] : memref<40x128xf32, #tpu.memory_space<vmem>>, vector<8x128xf32>
    %390 = vector.broadcast %7 : f32 to vector<8x128xf32>
    %391 = arith.mulf %390, %369 : vector<8x128xf32>
    %392 = vector.broadcast %8 : f32 to vector<8x128xf32>
    %393 = arith.mulf %392, %384 : vector<8x128xf32>
    %394 = arith.addf %391, %393 : vector<8x128xf32>
    %395 = vector.broadcast %25 : f32 to vector<8x128xf32>
    %396 = arith.addf %394, %395 : vector<8x128xf32>
    %397 = vector.broadcast %11 : f32 to vector<8x128xf32>
    %398 = arith.mulf %397, %369 : vector<8x128xf32>
    %399 = vector.broadcast %12 : f32 to vector<8x128xf32>
    %400 = arith.mulf %399, %384 : vector<8x128xf32>
    %401 = arith.addf %398, %400 : vector<8x128xf32>
    %402 = vector.broadcast %27 : f32 to vector<8x128xf32>
    %403 = arith.addf %401, %402 : vector<8x128xf32>
    %404 = vector.broadcast %15 : f32 to vector<8x128xf32>
    %405 = arith.mulf %404, %369 : vector<8x128xf32>
    %406 = vector.broadcast %16 : f32 to vector<8x128xf32>
    %407 = arith.mulf %406, %384 : vector<8x128xf32>
    %408 = arith.addf %405, %407 : vector<8x128xf32>
    %409 = vector.broadcast %29 : f32 to vector<8x128xf32>
    %410 = arith.addf %408, %409 : vector<8x128xf32>
    %411 = vector.broadcast %1 : f32 to vector<8x128xf32>
    %412 = arith.mulf %411, %389 : vector<8x128xf32>
    %413 = vector.broadcast %19 : f32 to vector<8x128xf32>
    %414 = arith.addf %412, %413 : vector<8x128xf32>
    %415 = arith.addf %414, %396 : vector<8x128xf32>
    %416 = arith.negf %415 : vector<8x128xf32>
    %417 = math.exp %416 : vector<8x128xf32>
    %cst_29 = arith.constant 1.000000e+00 : f32
    %418 = vector.broadcast %cst_29 : f32 to vector<8x128xf32>
    %419 = arith.addf %418, %417 : vector<8x128xf32>
    %420 = arith.divf %418, %419 : vector<8x128xf32>
    %421 = vector.broadcast %3 : f32 to vector<8x128xf32>
    %422 = arith.mulf %421, %389 : vector<8x128xf32>
    %423 = vector.broadcast %21 : f32 to vector<8x128xf32>
    %424 = arith.addf %422, %423 : vector<8x128xf32>
    %425 = arith.addf %424, %403 : vector<8x128xf32>
    %426 = arith.negf %425 : vector<8x128xf32>
    %427 = math.exp %426 : vector<8x128xf32>
    %cst_30 = arith.constant 1.000000e+00 : f32
    %428 = vector.broadcast %cst_30 : f32 to vector<8x128xf32>
    %429 = arith.addf %428, %427 : vector<8x128xf32>
    %430 = arith.divf %428, %429 : vector<8x128xf32>
    %431 = vector.broadcast %9 : f32 to vector<8x128xf32>
    %432 = arith.mulf %431, %369 : vector<8x128xf32>
    %433 = vector.broadcast %10 : f32 to vector<8x128xf32>
    %434 = arith.mulf %433, %384 : vector<8x128xf32>
    %435 = arith.addf %432, %434 : vector<8x128xf32>
    %436 = vector.broadcast %26 : f32 to vector<8x128xf32>
    %437 = arith.addf %435, %436 : vector<8x128xf32>
    %438 = vector.broadcast %13 : f32 to vector<8x128xf32>
    %439 = arith.mulf %438, %369 : vector<8x128xf32>
    %440 = vector.broadcast %14 : f32 to vector<8x128xf32>
    %441 = arith.mulf %440, %384 : vector<8x128xf32>
    %442 = arith.addf %439, %441 : vector<8x128xf32>
    %443 = vector.broadcast %28 : f32 to vector<8x128xf32>
    %444 = arith.addf %442, %443 : vector<8x128xf32>
    %445 = vector.broadcast %17 : f32 to vector<8x128xf32>
    %446 = arith.mulf %445, %369 : vector<8x128xf32>
    %447 = vector.broadcast %18 : f32 to vector<8x128xf32>
    %448 = arith.mulf %447, %384 : vector<8x128xf32>
    %449 = arith.addf %446, %448 : vector<8x128xf32>
    %450 = vector.broadcast %30 : f32 to vector<8x128xf32>
    %451 = arith.addf %449, %450 : vector<8x128xf32>
    %452 = vector.broadcast %2 : f32 to vector<8x128xf32>
    %453 = arith.mulf %452, %389 : vector<8x128xf32>
    %454 = vector.broadcast %20 : f32 to vector<8x128xf32>
    %455 = arith.addf %453, %454 : vector<8x128xf32>
    %456 = arith.addf %455, %437 : vector<8x128xf32>
    %457 = arith.negf %456 : vector<8x128xf32>
    %458 = math.exp %457 : vector<8x128xf32>
    %cst_31 = arith.constant 1.000000e+00 : f32
    %459 = vector.broadcast %cst_31 : f32 to vector<8x128xf32>
    %460 = arith.addf %459, %458 : vector<8x128xf32>
    %461 = arith.divf %459, %460 : vector<8x128xf32>
    %462 = vector.broadcast %4 : f32 to vector<8x128xf32>
    %463 = arith.mulf %462, %389 : vector<8x128xf32>
    %464 = vector.broadcast %22 : f32 to vector<8x128xf32>
    %465 = arith.addf %463, %464 : vector<8x128xf32>
    %466 = arith.addf %465, %444 : vector<8x128xf32>
    %467 = arith.negf %466 : vector<8x128xf32>
    %468 = math.exp %467 : vector<8x128xf32>
    %cst_32 = arith.constant 1.000000e+00 : f32
    %469 = vector.broadcast %cst_32 : f32 to vector<8x128xf32>
    %470 = arith.addf %469, %468 : vector<8x128xf32>
    %471 = arith.divf %469, %470 : vector<8x128xf32>
    %472 = vector.broadcast %5 : f32 to vector<8x128xf32>
    %473 = arith.mulf %472, %389 : vector<8x128xf32>
    %474 = vector.broadcast %23 : f32 to vector<8x128xf32>
    %475 = arith.addf %473, %474 : vector<8x128xf32>
    %476 = arith.mulf %420, %410 : vector<8x128xf32>
    %477 = arith.addf %475, %476 : vector<8x128xf32>
    %478 = math.tanh %477 : vector<8x128xf32>
    %cst_33 = arith.constant 1.000000e+00 : f32
    %479 = vector.broadcast %cst_33 : f32 to vector<8x128xf32>
    %480 = arith.subf %479, %430 : vector<8x128xf32>
    %481 = arith.mulf %480, %478 : vector<8x128xf32>
    %482 = arith.mulf %430, %369 : vector<8x128xf32>
    %483 = arith.addf %481, %482 : vector<8x128xf32>
    %484 = arith.mulf %483, %43 : vector<8x128xf32>
    %c48 = arith.constant 48 : index
    %485 = arith.index_cast %32 : i32 to index
    %486 = vector.load %arg5[%c48, %485] : memref<72x128xf32, #tpu.memory_space<vmem>>, vector<8x128xf32>
    tpu.vector_store %arg5[%c48, %485], %484 {strides = array<i32>} : memref<72x128xf32, #tpu.memory_space<vmem>>, vector<8x128xf32>,
    %487 = vector.broadcast %6 : f32 to vector<8x128xf32>
    %488 = arith.mulf %487, %389 : vector<8x128xf32>
    %489 = vector.broadcast %24 : f32 to vector<8x128xf32>
    %490 = arith.addf %488, %489 : vector<8x128xf32>
    %491 = arith.mulf %461, %451 : vector<8x128xf32>
    %492 = arith.addf %490, %491 : vector<8x128xf32>
    %493 = math.tanh %492 : vector<8x128xf32>
    %cst_34 = arith.constant 1.000000e+00 : f32
    %494 = vector.broadcast %cst_34 : f32 to vector<8x128xf32>
    %495 = arith.subf %494, %471 : vector<8x128xf32>
    %496 = arith.mulf %495, %493 : vector<8x128xf32>
    %497 = arith.mulf %471, %384 : vector<8x128xf32>
    %498 = arith.addf %496, %497 : vector<8x128xf32>
    %499 = arith.mulf %498, %43 : vector<8x128xf32>
    %c56 = arith.constant 56 : index
    %500 = arith.index_cast %32 : i32 to index
    %501 = vector.load %arg5[%c56, %500] : memref<72x128xf32, #tpu.memory_space<vmem>>, vector<8x128xf32>
    tpu.vector_store %arg5[%c56, %500], %499 {strides = array<i32>} : memref<72x128xf32, #tpu.memory_space<vmem>>, vector<8x128xf32>,
    %c32_35 = arith.constant 32 : index
    %502 = arith.index_cast %32 : i32 to index
    %503 = vector.load %arg3[%c32_35, %502] : memref<40x128xf32, #tpu.memory_space<vmem>>, vector<8x128xf32>
    %504 = arith.mulf %503, %43 : vector<8x128xf32>
    %c64 = arith.constant 64 : index
    %505 = arith.index_cast %32 : i32 to index
    %506 = vector.load %arg5[%c64, %505] : memref<72x128xf32, #tpu.memory_space<vmem>>, vector<8x128xf32>
    tpu.vector_store %arg5[%c64, %505], %504 {strides = array<i32>} : memref<72x128xf32, #tpu.memory_space<vmem>>, vector<8x128xf32>,
    %c1_i32 = arith.constant 1 : i32
    %507 = arith.sitofp %0 : i32 to f32
    %cst_36 = arith.constant 1.000000e+00 : f32
    %508 = arith.divf %cst_36, %507 : f32
    %c0_37 = arith.constant 0 : index
    %c0_38 = arith.constant 0 : index
    %509 = vector.load %arg5[%c0_37, %c0_38] : memref<72x128xf32, #tpu.memory_space<vmem>>, vector<8x128xf32>
    %510 = vector.shape_cast %509 : vector<8x128xf32> to vector<1x8x128xf32>
    %cst_39 = arith.constant dense<0.000000e+00> : vector<1xf32>
    %511 = vector.multi_reduction <add>, %510, %cst_39 [1, 2] : vector<1x8x128xf32> to vector<1xf32>
    %512 = vector.shape_cast %511 : vector<1xf32> to vector<1x1x1xf32>
    %513 = vector.extract %512[0, 0, 0] : f32 from vector<1x1x1xf32>
    %cst_40 = arith.constant 0.000000e+00 : f32
    %514 = arith.addf %cst_40, %513 : f32
    %515 = arith.mulf %509, %509 : vector<8x128xf32>
    %516 = vector.shape_cast %515 : vector<8x128xf32> to vector<1x8x128xf32>
    %cst_41 = arith.constant dense<0.000000e+00> : vector<1xf32>
    %517 = vector.multi_reduction <add>, %516, %cst_41 [1, 2] : vector<1x8x128xf32> to vector<1xf32>
    %518 = vector.shape_cast %517 : vector<1xf32> to vector<1x1x1xf32>
    %519 = vector.extract %518[0, 0, 0] : f32 from vector<1x1x1xf32>
    %cst_42 = arith.constant 0.000000e+00 : f32
    %520 = arith.addf %cst_42, %519 : f32
    %521 = arith.mulf %514, %508 : f32
    %522 = arith.mulf %520, %508 : f32
    %c30 = arith.constant 30 : index
    %523 = memref.load %arg2[%c30] : memref<67xf32, #tpu.memory_space<smem>>
    %c39 = arith.constant 39 : index
    %524 = memref.load %arg2[%c39] : memref<67xf32, #tpu.memory_space<smem>>
    %c48_43 = arith.constant 48 : index
    %525 = memref.load %arg2[%c48_43] : memref<67xf32, #tpu.memory_space<smem>>
    %cst_44 = arith.constant 2.000000e+00 : f32
    %526 = arith.mulf %cst_44, %525 : f32
    %527 = arith.mulf %525, %525 : f32
    %528 = arith.subf %526, %527 : f32
    %529 = arith.mulf %528, %521 : f32
    %530 = arith.mulf %529, %521 : f32
    %531 = arith.subf %522, %530 : f32
    %cst_45 = arith.constant 0.000000e+00 : f32
    %532 = arith.maximumf %531, %cst_45 : f32
    %cst_46 = arith.constant 9.99999974E-6 : f32
    %533 = arith.addf %532, %cst_46 : f32
    %534 = math.rsqrt %533 : f32
    %535 = arith.mulf %523, %534 : f32
    %536 = arith.mulf %523, %534 : f32
    %537 = arith.mulf %536, %525 : f32
    %538 = arith.mulf %537, %521 : f32
    %539 = arith.subf %524, %538 : f32
    %c8_47 = arith.constant 8 : index
    %c0_48 = arith.constant 0 : index
    %540 = vector.load %arg5[%c8_47, %c0_48] : memref<72x128xf32, #tpu.memory_space<vmem>>, vector<8x128xf32>
    %541 = vector.shape_cast %540 : vector<8x128xf32> to vector<1x8x128xf32>
    %cst_49 = arith.constant dense<0.000000e+00> : vector<1xf32>
    %542 = vector.multi_reduction <add>, %541, %cst_49 [1, 2] : vector<1x8x128xf32> to vector<1xf32>
    %543 = vector.shape_cast %542 : vector<1xf32> to vector<1x1x1xf32>
    %544 = vector.extract %543[0, 0, 0] : f32 from vector<1x1x1xf32>
    %cst_50 = arith.constant 0.000000e+00 : f32
    %545 = arith.addf %cst_50, %544 : f32
    %546 = arith.mulf %540, %540 : vector<8x128xf32>
    %547 = vector.shape_cast %546 : vector<8x128xf32> to vector<1x8x128xf32>
    %cst_51 = arith.constant dense<0.000000e+00> : vector<1xf32>
    %548 = vector.multi_reduction <add>, %547, %cst_51 [1, 2] : vector<1x8x128xf32> to vector<1xf32>
    %549 = vector.shape_cast %548 : vector<1xf32> to vector<1x1x1xf32>
    %550 = vector.extract %549[0, 0, 0] : f32 from vector<1x1x1xf32>
    %cst_52 = arith.constant 0.000000e+00 : f32
    %551 = arith.addf %cst_52, %550 : f32
    %552 = arith.mulf %545, %508 : f32
    %553 = arith.mulf %551, %508 : f32
    %c31 = arith.constant 31 : index
    %554 = memref.load %arg2[%c31] : memref<67xf32, #tpu.memory_space<smem>>
    %c40_53 = arith.constant 40 : index
    %555 = memref.load %arg2[%c40_53] : memref<67xf32, #tpu.memory_space<smem>>
    %c49 = arith.constant 49 : index
    %556 = memref.load %arg2[%c49] : memref<67xf32, #tpu.memory_space<smem>>
    %cst_54 = arith.constant 2.000000e+00 : f32
    %557 = arith.mulf %cst_54, %556 : f32
    %558 = arith.mulf %556, %556 : f32
    %559 = arith.subf %557, %558 : f32
    %560 = arith.mulf %559, %552 : f32
    %561 = arith.mulf %560, %552 : f32
    %562 = arith.subf %553, %561 : f32
    %cst_55 = arith.constant 0.000000e+00 : f32
    %563 = arith.maximumf %562, %cst_55 : f32
    %cst_56 = arith.constant 9.99999974E-6 : f32
    %564 = arith.addf %563, %cst_56 : f32
    %565 = math.rsqrt %564 : f32
    %566 = arith.mulf %554, %565 : f32
    %567 = arith.mulf %554, %565 : f32
    %568 = arith.mulf %567, %556 : f32
    %569 = arith.mulf %568, %552 : f32
    %570 = arith.subf %555, %569 : f32
    %c16_57 = arith.constant 16 : index
    %c0_58 = arith.constant 0 : index
    %571 = vector.load %arg5[%c16_57, %c0_58] : memref<72x128xf32, #tpu.memory_space<vmem>>, vector<8x128xf32>
    %572 = vector.shape_cast %571 : vector<8x128xf32> to vector<1x8x128xf32>
    %cst_59 = arith.constant dense<0.000000e+00> : vector<1xf32>
    %573 = vector.multi_reduction <add>, %572, %cst_59 [1, 2] : vector<1x8x128xf32> to vector<1xf32>
    %574 = vector.shape_cast %573 : vector<1xf32> to vector<1x1x1xf32>
    %575 = vector.extract %574[0, 0, 0] : f32 from vector<1x1x1xf32>
    %cst_60 = arith.constant 0.000000e+00 : f32
    %576 = arith.addf %cst_60, %575 : f32
    %577 = arith.mulf %571, %571 : vector<8x128xf32>
    %578 = vector.shape_cast %577 : vector<8x128xf32> to vector<1x8x128xf32>
    %cst_61 = arith.constant dense<0.000000e+00> : vector<1xf32>
    %579 = vector.multi_reduction <add>, %578, %cst_61 [1, 2] : vector<1x8x128xf32> to vector<1xf32>
    %580 = vector.shape_cast %579 : vector<1xf32> to vector<1x1x1xf32>
    %581 = vector.extract %580[0, 0, 0] : f32 from vector<1x1x1xf32>
    %cst_62 = arith.constant 0.000000e+00 : f32
    %582 = arith.addf %cst_62, %581 : f32
    %583 = arith.mulf %576, %508 : f32
    %584 = arith.mulf %582, %508 : f32
    %c32_63 = arith.constant 32 : index
    %585 = memref.load %arg2[%c32_63] : memref<67xf32, #tpu.memory_space<smem>>
    %c41 = arith.constant 41 : index
    %586 = memref.load %arg2[%c41] : memref<67xf32, #tpu.memory_space<smem>>
    %c50 = arith.constant 50 : index
    %587 = memref.load %arg2[%c50] : memref<67xf32, #tpu.memory_space<smem>>
    %cst_64 = arith.constant 2.000000e+00 : f32
    %588 = arith.mulf %cst_64, %587 : f32
    %589 = arith.mulf %587, %587 : f32
    %590 = arith.subf %588, %589 : f32
    %591 = arith.mulf %590, %583 : f32
    %592 = arith.mulf %591, %583 : f32
    %593 = arith.subf %584, %592 : f32
    %cst_65 = arith.constant 0.000000e+00 : f32
    %594 = arith.maximumf %593, %cst_65 : f32
    %cst_66 = arith.constant 9.99999974E-6 : f32
    %595 = arith.addf %594, %cst_66 : f32
    %596 = math.rsqrt %595 : f32
    %597 = arith.mulf %585, %596 : f32
    %598 = arith.mulf %585, %596 : f32
    %599 = arith.mulf %598, %587 : f32
    %600 = arith.mulf %599, %583 : f32
    %601 = arith.subf %586, %600 : f32
    %c24_67 = arith.constant 24 : index
    %c0_68 = arith.constant 0 : index
    %602 = vector.load %arg5[%c24_67, %c0_68] : memref<72x128xf32, #tpu.memory_space<vmem>>, vector<8x128xf32>
    %603 = vector.shape_cast %602 : vector<8x128xf32> to vector<1x8x128xf32>
    %cst_69 = arith.constant dense<0.000000e+00> : vector<1xf32>
    %604 = vector.multi_reduction <add>, %603, %cst_69 [1, 2] : vector<1x8x128xf32> to vector<1xf32>
    %605 = vector.shape_cast %604 : vector<1xf32> to vector<1x1x1xf32>
    %606 = vector.extract %605[0, 0, 0] : f32 from vector<1x1x1xf32>
    %cst_70 = arith.constant 0.000000e+00 : f32
    %607 = arith.addf %cst_70, %606 : f32
    %608 = arith.mulf %602, %602 : vector<8x128xf32>
    %609 = vector.shape_cast %608 : vector<8x128xf32> to vector<1x8x128xf32>
    %cst_71 = arith.constant dense<0.000000e+00> : vector<1xf32>
    %610 = vector.multi_reduction <add>, %609, %cst_71 [1, 2] : vector<1x8x128xf32> to vector<1xf32>
    %611 = vector.shape_cast %610 : vector<1xf32> to vector<1x1x1xf32>
    %612 = vector.extract %611[0, 0, 0] : f32 from vector<1x1x1xf32>
    %cst_72 = arith.constant 0.000000e+00 : f32
    %613 = arith.addf %cst_72, %612 : f32
    %614 = arith.mulf %607, %508 : f32
    %615 = arith.mulf %613, %508 : f32
    %c33 = arith.constant 33 : index
    %616 = memref.load %arg2[%c33] : memref<67xf32, #tpu.memory_space<smem>>
    %c42 = arith.constant 42 : index
    %617 = memref.load %arg2[%c42] : memref<67xf32, #tpu.memory_space<smem>>
    %c51 = arith.constant 51 : index
    %618 = memref.load %arg2[%c51] : memref<67xf32, #tpu.memory_space<smem>>
    %cst_73 = arith.constant 2.000000e+00 : f32
    %619 = arith.mulf %cst_73, %618 : f32
    %620 = arith.mulf %618, %618 : f32
    %621 = arith.subf %619, %620 : f32
    %622 = arith.mulf %621, %614 : f32
    %623 = arith.mulf %622, %614 : f32
    %624 = arith.subf %615, %623 : f32
    %cst_74 = arith.constant 0.000000e+00 : f32
    %625 = arith.maximumf %624, %cst_74 : f32
    %cst_75 = arith.constant 9.99999974E-6 : f32
    %626 = arith.addf %625, %cst_75 : f32
    %627 = math.rsqrt %626 : f32
    %628 = arith.mulf %616, %627 : f32
    %629 = arith.mulf %616, %627 : f32
    %630 = arith.mulf %629, %618 : f32
    %631 = arith.mulf %630, %614 : f32
    %632 = arith.subf %617, %631 : f32
    %c32_76 = arith.constant 32 : index
    %c0_77 = arith.constant 0 : index
    %633 = vector.load %arg5[%c32_76, %c0_77] : memref<72x128xf32, #tpu.memory_space<vmem>>, vector<8x128xf32>
    %634 = vector.shape_cast %633 : vector<8x128xf32> to vector<1x8x128xf32>
    %cst_78 = arith.constant dense<0.000000e+00> : vector<1xf32>
    %635 = vector.multi_reduction <add>, %634, %cst_78 [1, 2] : vector<1x8x128xf32> to vector<1xf32>
    %636 = vector.shape_cast %635 : vector<1xf32> to vector<1x1x1xf32>
    %637 = vector.extract %636[0, 0, 0] : f32 from vector<1x1x1xf32>
    %cst_79 = arith.constant 0.000000e+00 : f32
    %638 = arith.addf %cst_79, %637 : f32
    %639 = arith.mulf %633, %633 : vector<8x128xf32>
    %640 = vector.shape_cast %639 : vector<8x128xf32> to vector<1x8x128xf32>
    %cst_80 = arith.constant dense<0.000000e+00> : vector<1xf32>
    %641 = vector.multi_reduction <add>, %640, %cst_80 [1, 2] : vector<1x8x128xf32> to vector<1xf32>
    %642 = vector.shape_cast %641 : vector<1xf32> to vector<1x1x1xf32>
    %643 = vector.extract %642[0, 0, 0] : f32 from vector<1x1x1xf32>
    %cst_81 = arith.constant 0.000000e+00 : f32
    %644 = arith.addf %cst_81, %643 : f32
    %645 = arith.mulf %638, %508 : f32
    %646 = arith.mulf %644, %508 : f32
    %c34 = arith.constant 34 : index
    %647 = memref.load %arg2[%c34] : memref<67xf32, #tpu.memory_space<smem>>
    %c43 = arith.constant 43 : index
    %648 = memref.load %arg2[%c43] : memref<67xf32, #tpu.memory_space<smem>>
    %c52 = arith.constant 52 : index
    %649 = memref.load %arg2[%c52] : memref<67xf32, #tpu.memory_space<smem>>
    %cst_82 = arith.constant 2.000000e+00 : f32
    %650 = arith.mulf %cst_82, %649 : f32
    %651 = arith.mulf %649, %649 : f32
    %652 = arith.subf %650, %651 : f32
    %653 = arith.mulf %652, %645 : f32
    %654 = arith.mulf %653, %645 : f32
    %655 = arith.subf %646, %654 : f32
    %cst_83 = arith.constant 0.000000e+00 : f32
    %656 = arith.maximumf %655, %cst_83 : f32
    %cst_84 = arith.constant 9.99999974E-6 : f32
    %657 = arith.addf %656, %cst_84 : f32
    %658 = math.rsqrt %657 : f32
    %659 = arith.mulf %647, %658 : f32
    %660 = arith.mulf %647, %658 : f32
    %661 = arith.mulf %660, %649 : f32
    %662 = arith.mulf %661, %645 : f32
    %663 = arith.subf %648, %662 : f32
    %c40_85 = arith.constant 40 : index
    %c0_86 = arith.constant 0 : index
    %664 = vector.load %arg5[%c40_85, %c0_86] : memref<72x128xf32, #tpu.memory_space<vmem>>, vector<8x128xf32>
    %665 = vector.shape_cast %664 : vector<8x128xf32> to vector<1x8x128xf32>
    %cst_87 = arith.constant dense<0.000000e+00> : vector<1xf32>
    %666 = vector.multi_reduction <add>, %665, %cst_87 [1, 2] : vector<1x8x128xf32> to vector<1xf32>
    %667 = vector.shape_cast %666 : vector<1xf32> to vector<1x1x1xf32>
    %668 = vector.extract %667[0, 0, 0] : f32 from vector<1x1x1xf32>
    %cst_88 = arith.constant 0.000000e+00 : f32
    %669 = arith.addf %cst_88, %668 : f32
    %670 = arith.mulf %664, %664 : vector<8x128xf32>
    %671 = vector.shape_cast %670 : vector<8x128xf32> to vector<1x8x128xf32>
    %cst_89 = arith.constant dense<0.000000e+00> : vector<1xf32>
    %672 = vector.multi_reduction <add>, %671, %cst_89 [1, 2] : vector<1x8x128xf32> to vector<1xf32>
    %673 = vector.shape_cast %672 : vector<1xf32> to vector<1x1x1xf32>
    %674 = vector.extract %673[0, 0, 0] : f32 from vector<1x1x1xf32>
    %cst_90 = arith.constant 0.000000e+00 : f32
    %675 = arith.addf %cst_90, %674 : f32
    %676 = arith.mulf %669, %508 : f32
    %677 = arith.mulf %675, %508 : f32
    %c35 = arith.constant 35 : index
    %678 = memref.load %arg2[%c35] : memref<67xf32, #tpu.memory_space<smem>>
    %c44 = arith.constant 44 : index
    %679 = memref.load %arg2[%c44] : memref<67xf32, #tpu.memory_space<smem>>
    %c53 = arith.constant 53 : index
    %680 = memref.load %arg2[%c53] : memref<67xf32, #tpu.memory_space<smem>>
    %cst_91 = arith.constant 2.000000e+00 : f32
    %681 = arith.mulf %cst_91, %680 : f32
    %682 = arith.mulf %680, %680 : f32
    %683 = arith.subf %681, %682 : f32
    %684 = arith.mulf %683, %676 : f32
    %685 = arith.mulf %684, %676 : f32
    %686 = arith.subf %677, %685 : f32
    %cst_92 = arith.constant 0.000000e+00 : f32
    %687 = arith.maximumf %686, %cst_92 : f32
    %cst_93 = arith.constant 9.99999974E-6 : f32
    %688 = arith.addf %687, %cst_93 : f32
    %689 = math.rsqrt %688 : f32
    %690 = arith.mulf %678, %689 : f32
    %691 = arith.mulf %678, %689 : f32
    %692 = arith.mulf %691, %680 : f32
    %693 = arith.mulf %692, %676 : f32
    %694 = arith.subf %679, %693 : f32
    %c48_94 = arith.constant 48 : index
    %c0_95 = arith.constant 0 : index
    %695 = vector.load %arg5[%c48_94, %c0_95] : memref<72x128xf32, #tpu.memory_space<vmem>>, vector<8x128xf32>
    %696 = vector.shape_cast %695 : vector<8x128xf32> to vector<1x8x128xf32>
    %cst_96 = arith.constant dense<0.000000e+00> : vector<1xf32>
    %697 = vector.multi_reduction <add>, %696, %cst_96 [1, 2] : vector<1x8x128xf32> to vector<1xf32>
    %698 = vector.shape_cast %697 : vector<1xf32> to vector<1x1x1xf32>
    %699 = vector.extract %698[0, 0, 0] : f32 from vector<1x1x1xf32>
    %cst_97 = arith.constant 0.000000e+00 : f32
    %700 = arith.addf %cst_97, %699 : f32
    %701 = arith.mulf %695, %695 : vector<8x128xf32>
    %702 = vector.shape_cast %701 : vector<8x128xf32> to vector<1x8x128xf32>
    %cst_98 = arith.constant dense<0.000000e+00> : vector<1xf32>
    %703 = vector.multi_reduction <add>, %702, %cst_98 [1, 2] : vector<1x8x128xf32> to vector<1xf32>
    %704 = vector.shape_cast %703 : vector<1xf32> to vector<1x1x1xf32>
    %705 = vector.extract %704[0, 0, 0] : f32 from vector<1x1x1xf32>
    %cst_99 = arith.constant 0.000000e+00 : f32
    %706 = arith.addf %cst_99, %705 : f32
    %707 = arith.mulf %700, %508 : f32
    %708 = arith.mulf %706, %508 : f32
    %c36 = arith.constant 36 : index
    %709 = memref.load %arg2[%c36] : memref<67xf32, #tpu.memory_space<smem>>
    %c45 = arith.constant 45 : index
    %710 = memref.load %arg2[%c45] : memref<67xf32, #tpu.memory_space<smem>>
    %c54 = arith.constant 54 : index
    %711 = memref.load %arg2[%c54] : memref<67xf32, #tpu.memory_space<smem>>
    %cst_100 = arith.constant 2.000000e+00 : f32
    %712 = arith.mulf %cst_100, %711 : f32
    %713 = arith.mulf %711, %711 : f32
    %714 = arith.subf %712, %713 : f32
    %715 = arith.mulf %714, %707 : f32
    %716 = arith.mulf %715, %707 : f32
    %717 = arith.subf %708, %716 : f32
    %cst_101 = arith.constant 0.000000e+00 : f32
    %718 = arith.maximumf %717, %cst_101 : f32
    %cst_102 = arith.constant 9.99999974E-6 : f32
    %719 = arith.addf %718, %cst_102 : f32
    %720 = math.rsqrt %719 : f32
    %721 = arith.mulf %709, %720 : f32
    %722 = arith.mulf %709, %720 : f32
    %723 = arith.mulf %722, %711 : f32
    %724 = arith.mulf %723, %707 : f32
    %725 = arith.subf %710, %724 : f32
    %c56_103 = arith.constant 56 : index
    %c0_104 = arith.constant 0 : index
    %726 = vector.load %arg5[%c56_103, %c0_104] : memref<72x128xf32, #tpu.memory_space<vmem>>, vector<8x128xf32>
    %727 = vector.shape_cast %726 : vector<8x128xf32> to vector<1x8x128xf32>
    %cst_105 = arith.constant dense<0.000000e+00> : vector<1xf32>
    %728 = vector.multi_reduction <add>, %727, %cst_105 [1, 2] : vector<1x8x128xf32> to vector<1xf32>
    %729 = vector.shape_cast %728 : vector<1xf32> to vector<1x1x1xf32>
    %730 = vector.extract %729[0, 0, 0] : f32 from vector<1x1x1xf32>
    %cst_106 = arith.constant 0.000000e+00 : f32
    %731 = arith.addf %cst_106, %730 : f32
    %732 = arith.mulf %726, %726 : vector<8x128xf32>
    %733 = vector.shape_cast %732 : vector<8x128xf32> to vector<1x8x128xf32>
    %cst_107 = arith.constant dense<0.000000e+00> : vector<1xf32>
    %734 = vector.multi_reduction <add>, %733, %cst_107 [1, 2] : vector<1x8x128xf32> to vector<1xf32>
    %735 = vector.shape_cast %734 : vector<1xf32> to vector<1x1x1xf32>
    %736 = vector.extract %735[0, 0, 0] : f32 from vector<1x1x1xf32>
    %cst_108 = arith.constant 0.000000e+00 : f32
    %737 = arith.addf %cst_108, %736 : f32
    %738 = arith.mulf %731, %508 : f32
    %739 = arith.mulf %737, %508 : f32
    %c37 = arith.constant 37 : index
    %740 = memref.load %arg2[%c37] : memref<67xf32, #tpu.memory_space<smem>>
    %c46 = arith.constant 46 : index
    %741 = memref.load %arg2[%c46] : memref<67xf32, #tpu.memory_space<smem>>
    %c55 = arith.constant 55 : index
    %742 = memref.load %arg2[%c55] : memref<67xf32, #tpu.memory_space<smem>>
    %cst_109 = arith.constant 2.000000e+00 : f32
    %743 = arith.mulf %cst_109, %742 : f32
    %744 = arith.mulf %742, %742 : f32
    %745 = arith.subf %743, %744 : f32
    %746 = arith.mulf %745, %738 : f32
    %747 = arith.mulf %746, %738 : f32
    %748 = arith.subf %739, %747 : f32
    %cst_110 = arith.constant 0.000000e+00 : f32
    %749 = arith.maximumf %748, %cst_110 : f32
    %cst_111 = arith.constant 9.99999974E-6 : f32
    %750 = arith.addf %749, %cst_111 : f32
    %751 = math.rsqrt %750 : f32
    %752 = arith.mulf %740, %751 : f32
    %753 = arith.mulf %740, %751 : f32
    %754 = arith.mulf %753, %742 : f32
    %755 = arith.mulf %754, %738 : f32
    %756 = arith.subf %741, %755 : f32
    %c64_112 = arith.constant 64 : index
    %c0_113 = arith.constant 0 : index
    %757 = vector.load %arg5[%c64_112, %c0_113] : memref<72x128xf32, #tpu.memory_space<vmem>>, vector<8x128xf32>
    %758 = vector.shape_cast %757 : vector<8x128xf32> to vector<1x8x128xf32>
    %cst_114 = arith.constant dense<0.000000e+00> : vector<1xf32>
    %759 = vector.multi_reduction <add>, %758, %cst_114 [1, 2] : vector<1x8x128xf32> to vector<1xf32>
    %760 = vector.shape_cast %759 : vector<1xf32> to vector<1x1x1xf32>
    %761 = vector.extract %760[0, 0, 0] : f32 from vector<1x1x1xf32>
    %cst_115 = arith.constant 0.000000e+00 : f32
    %762 = arith.addf %cst_115, %761 : f32
    %763 = arith.mulf %757, %757 : vector<8x128xf32>
    %764 = vector.shape_cast %763 : vector<8x128xf32> to vector<1x8x128xf32>
    %cst_116 = arith.constant dense<0.000000e+00> : vector<1xf32>
    %765 = vector.multi_reduction <add>, %764, %cst_116 [1, 2] : vector<1x8x128xf32> to vector<1xf32>
    %766 = vector.shape_cast %765 : vector<1xf32> to vector<1x1x1xf32>
    %767 = vector.extract %766[0, 0, 0] : f32 from vector<1x1x1xf32>
    %cst_117 = arith.constant 0.000000e+00 : f32
    %768 = arith.addf %cst_117, %767 : f32
    %769 = arith.mulf %762, %508 : f32
    %770 = arith.mulf %768, %508 : f32
    %c38 = arith.constant 38 : index
    %771 = memref.load %arg2[%c38] : memref<67xf32, #tpu.memory_space<smem>>
    %c47 = arith.constant 47 : index
    %772 = memref.load %arg2[%c47] : memref<67xf32, #tpu.memory_space<smem>>
    %c56_118 = arith.constant 56 : index
    %773 = memref.load %arg2[%c56_118] : memref<67xf32, #tpu.memory_space<smem>>
    %cst_119 = arith.constant 2.000000e+00 : f32
    %774 = arith.mulf %cst_119, %773 : f32
    %775 = arith.mulf %773, %773 : f32
    %776 = arith.subf %774, %775 : f32
    %777 = arith.mulf %776, %769 : f32
    %778 = arith.mulf %777, %769 : f32
    %779 = arith.subf %770, %778 : f32
    %cst_120 = arith.constant 0.000000e+00 : f32
    %780 = arith.maximumf %779, %cst_120 : f32
    %cst_121 = arith.constant 9.99999974E-6 : f32
    %781 = arith.addf %780, %cst_121 : f32
    %782 = math.rsqrt %781 : f32
    %783 = arith.mulf %771, %782 : f32
    %784 = arith.mulf %771, %782 : f32
    %785 = arith.mulf %784, %773 : f32
    %786 = arith.mulf %785, %769 : f32
    %787 = arith.subf %772, %786 : f32
    %c57 = arith.constant 57 : index
    %788 = memref.load %arg2[%c57] : memref<67xf32, #tpu.memory_space<smem>>
    %c58 = arith.constant 58 : index
    %789 = memref.load %arg2[%c58] : memref<67xf32, #tpu.memory_space<smem>>
    %c59 = arith.constant 59 : index
    %790 = memref.load %arg2[%c59] : memref<67xf32, #tpu.memory_space<smem>>
    %c60 = arith.constant 60 : index
    %791 = memref.load %arg2[%c60] : memref<67xf32, #tpu.memory_space<smem>>
    %c61 = arith.constant 61 : index
    %792 = memref.load %arg2[%c61] : memref<67xf32, #tpu.memory_space<smem>>
    %c62 = arith.constant 62 : index
    %793 = memref.load %arg2[%c62] : memref<67xf32, #tpu.memory_space<smem>>
    %c63 = arith.constant 63 : index
    %794 = memref.load %arg2[%c63] : memref<67xf32, #tpu.memory_space<smem>>
    %c64_122 = arith.constant 64 : index
    %795 = memref.load %arg2[%c64_122] : memref<67xf32, #tpu.memory_space<smem>>
    %c65 = arith.constant 65 : index
    %796 = memref.load %arg2[%c65] : memref<67xf32, #tpu.memory_space<smem>>
    %c66 = arith.constant 66 : index
    %797 = memref.load %arg2[%c66] : memref<67xf32, #tpu.memory_space<smem>>
    %c0_i32_123 = arith.constant 0 : i32
    %c128_i32_124 = arith.constant 128 : i32
    %798 = arith.muli %c0_i32_123, %c128_i32_124 : i32
    %799 = tpu.assume_multiple %798, 128 : i32
    %cst_125 = arith.constant 0.000000e+00 : f32
    %800 = vector.broadcast %cst_125 : f32 to vector<8x128xf32>
    %c0_126 = arith.constant 0 : index
    %801 = arith.index_cast %799 : i32 to index
    %802 = vector.load %arg5[%c0_126, %801] : memref<72x128xf32, #tpu.memory_space<vmem>>, vector<8x128xf32>
    %803 = vector.broadcast %535 : f32 to vector<8x128xf32>
    %804 = arith.mulf %803, %802 : vector<8x128xf32>
    %805 = vector.broadcast %539 : f32 to vector<8x128xf32>
    %806 = arith.addf %804, %805 : vector<8x128xf32>
    %cst_127 = arith.constant 0.000000e+00 : f32
    %807 = vector.broadcast %cst_127 : f32 to vector<8x128xf32>
    %808 = arith.cmpf ogt, %806, %807 : vector<8x128xf32>
    %cst_128 = arith.constant 0.00999999977 : f32
    %809 = vector.broadcast %cst_128 : f32 to vector<8x128xf32>
    %810 = arith.mulf %809, %806 : vector<8x128xf32>
    %811 = arith.select %808, %806, %810 : vector<8x128xi1>, vector<8x128xf32>
    %812 = vector.broadcast %788 : f32 to vector<8x128xf32>
    %813 = arith.mulf %812, %811 : vector<8x128xf32>
    %814 = arith.addf %800, %813 : vector<8x128xf32>
    %c8_129 = arith.constant 8 : index
    %815 = arith.index_cast %799 : i32 to index
    %816 = vector.load %arg5[%c8_129, %815] : memref<72x128xf32, #tpu.memory_space<vmem>>, vector<8x128xf32>
    %817 = vector.broadcast %566 : f32 to vector<8x128xf32>
    %818 = arith.mulf %817, %816 : vector<8x128xf32>
    %819 = vector.broadcast %570 : f32 to vector<8x128xf32>
    %820 = arith.addf %818, %819 : vector<8x128xf32>
    %cst_130 = arith.constant 0.000000e+00 : f32
    %821 = vector.broadcast %cst_130 : f32 to vector<8x128xf32>
    %822 = arith.cmpf ogt, %820, %821 : vector<8x128xf32>
    %cst_131 = arith.constant 0.00999999977 : f32
    %823 = vector.broadcast %cst_131 : f32 to vector<8x128xf32>
    %824 = arith.mulf %823, %820 : vector<8x128xf32>
    %825 = arith.select %822, %820, %824 : vector<8x128xi1>, vector<8x128xf32>
    %826 = vector.broadcast %789 : f32 to vector<8x128xf32>
    %827 = arith.mulf %826, %825 : vector<8x128xf32>
    %828 = arith.addf %814, %827 : vector<8x128xf32>
    %c16_132 = arith.constant 16 : index
    %829 = arith.index_cast %799 : i32 to index
    %830 = vector.load %arg5[%c16_132, %829] : memref<72x128xf32, #tpu.memory_space<vmem>>, vector<8x128xf32>
    %831 = vector.broadcast %597 : f32 to vector<8x128xf32>
    %832 = arith.mulf %831, %830 : vector<8x128xf32>
    %833 = vector.broadcast %601 : f32 to vector<8x128xf32>
    %834 = arith.addf %832, %833 : vector<8x128xf32>
    %cst_133 = arith.constant 0.000000e+00 : f32
    %835 = vector.broadcast %cst_133 : f32 to vector<8x128xf32>
    %836 = arith.cmpf ogt, %834, %835 : vector<8x128xf32>
    %cst_134 = arith.constant 0.00999999977 : f32
    %837 = vector.broadcast %cst_134 : f32 to vector<8x128xf32>
    %838 = arith.mulf %837, %834 : vector<8x128xf32>
    %839 = arith.select %836, %834, %838 : vector<8x128xi1>, vector<8x128xf32>
    %840 = vector.broadcast %790 : f32 to vector<8x128xf32>
    %841 = arith.mulf %840, %839 : vector<8x128xf32>
    %842 = arith.addf %828, %841 : vector<8x128xf32>
    %c24_135 = arith.constant 24 : index
    %843 = arith.index_cast %799 : i32 to index
    %844 = vector.load %arg5[%c24_135, %843] : memref<72x128xf32, #tpu.memory_space<vmem>>, vector<8x128xf32>
    %845 = vector.broadcast %628 : f32 to vector<8x128xf32>
    %846 = arith.mulf %845, %844 : vector<8x128xf32>
    %847 = vector.broadcast %632 : f32 to vector<8x128xf32>
    %848 = arith.addf %846, %847 : vector<8x128xf32>
    %cst_136 = arith.constant 0.000000e+00 : f32
    %849 = vector.broadcast %cst_136 : f32 to vector<8x128xf32>
    %850 = arith.cmpf ogt, %848, %849 : vector<8x128xf32>
    %cst_137 = arith.constant 0.00999999977 : f32
    %851 = vector.broadcast %cst_137 : f32 to vector<8x128xf32>
    %852 = arith.mulf %851, %848 : vector<8x128xf32>
    %853 = arith.select %850, %848, %852 : vector<8x128xi1>, vector<8x128xf32>
    %854 = vector.broadcast %791 : f32 to vector<8x128xf32>
    %855 = arith.mulf %854, %853 : vector<8x128xf32>
    %856 = arith.addf %842, %855 : vector<8x128xf32>
    %c32_138 = arith.constant 32 : index
    %857 = arith.index_cast %799 : i32 to index
    %858 = vector.load %arg5[%c32_138, %857] : memref<72x128xf32, #tpu.memory_space<vmem>>, vector<8x128xf32>
    %859 = vector.broadcast %659 : f32 to vector<8x128xf32>
    %860 = arith.mulf %859, %858 : vector<8x128xf32>
    %861 = vector.broadcast %663 : f32 to vector<8x128xf32>
    %862 = arith.addf %860, %861 : vector<8x128xf32>
    %cst_139 = arith.constant 0.000000e+00 : f32
    %863 = vector.broadcast %cst_139 : f32 to vector<8x128xf32>
    %864 = arith.cmpf ogt, %862, %863 : vector<8x128xf32>
    %cst_140 = arith.constant 0.00999999977 : f32
    %865 = vector.broadcast %cst_140 : f32 to vector<8x128xf32>
    %866 = arith.mulf %865, %862 : vector<8x128xf32>
    %867 = arith.select %864, %862, %866 : vector<8x128xi1>, vector<8x128xf32>
    %868 = vector.broadcast %792 : f32 to vector<8x128xf32>
    %869 = arith.mulf %868, %867 : vector<8x128xf32>
    %870 = arith.addf %856, %869 : vector<8x128xf32>
    %c40_141 = arith.constant 40 : index
    %871 = arith.index_cast %799 : i32 to index
    %872 = vector.load %arg5[%c40_141, %871] : memref<72x128xf32, #tpu.memory_space<vmem>>, vector<8x128xf32>
    %873 = vector.broadcast %690 : f32 to vector<8x128xf32>
    %874 = arith.mulf %873, %872 : vector<8x128xf32>
    %875 = vector.broadcast %694 : f32 to vector<8x128xf32>
    %876 = arith.addf %874, %875 : vector<8x128xf32>
    %cst_142 = arith.constant 0.000000e+00 : f32
    %877 = vector.broadcast %cst_142 : f32 to vector<8x128xf32>
    %878 = arith.cmpf ogt, %876, %877 : vector<8x128xf32>
    %cst_143 = arith.constant 0.00999999977 : f32
    %879 = vector.broadcast %cst_143 : f32 to vector<8x128xf32>
    %880 = arith.mulf %879, %876 : vector<8x128xf32>
    %881 = arith.select %878, %876, %880 : vector<8x128xi1>, vector<8x128xf32>
    %882 = vector.broadcast %793 : f32 to vector<8x128xf32>
    %883 = arith.mulf %882, %881 : vector<8x128xf32>
    %884 = arith.addf %870, %883 : vector<8x128xf32>
    %c48_144 = arith.constant 48 : index
    %885 = arith.index_cast %799 : i32 to index
    %886 = vector.load %arg5[%c48_144, %885] : memref<72x128xf32, #tpu.memory_space<vmem>>, vector<8x128xf32>
    %887 = vector.broadcast %721 : f32 to vector<8x128xf32>
    %888 = arith.mulf %887, %886 : vector<8x128xf32>
    %889 = vector.broadcast %725 : f32 to vector<8x128xf32>
    %890 = arith.addf %888, %889 : vector<8x128xf32>
    %cst_145 = arith.constant 0.000000e+00 : f32
    %891 = vector.broadcast %cst_145 : f32 to vector<8x128xf32>
    %892 = arith.cmpf ogt, %890, %891 : vector<8x128xf32>
    %cst_146 = arith.constant 0.00999999977 : f32
    %893 = vector.broadcast %cst_146 : f32 to vector<8x128xf32>
    %894 = arith.mulf %893, %890 : vector<8x128xf32>
    %895 = arith.select %892, %890, %894 : vector<8x128xi1>, vector<8x128xf32>
    %896 = vector.broadcast %794 : f32 to vector<8x128xf32>
    %897 = arith.mulf %896, %895 : vector<8x128xf32>
    %898 = arith.addf %884, %897 : vector<8x128xf32>
    %c56_147 = arith.constant 56 : index
    %899 = arith.index_cast %799 : i32 to index
    %900 = vector.load %arg5[%c56_147, %899] : memref<72x128xf32, #tpu.memory_space<vmem>>, vector<8x128xf32>
    %901 = vector.broadcast %752 : f32 to vector<8x128xf32>
    %902 = arith.mulf %901, %900 : vector<8x128xf32>
    %903 = vector.broadcast %756 : f32 to vector<8x128xf32>
    %904 = arith.addf %902, %903 : vector<8x128xf32>
    %cst_148 = arith.constant 0.000000e+00 : f32
    %905 = vector.broadcast %cst_148 : f32 to vector<8x128xf32>
    %906 = arith.cmpf ogt, %904, %905 : vector<8x128xf32>
    %cst_149 = arith.constant 0.00999999977 : f32
    %907 = vector.broadcast %cst_149 : f32 to vector<8x128xf32>
    %908 = arith.mulf %907, %904 : vector<8x128xf32>
    %909 = arith.select %906, %904, %908 : vector<8x128xi1>, vector<8x128xf32>
    %910 = vector.broadcast %795 : f32 to vector<8x128xf32>
    %911 = arith.mulf %910, %909 : vector<8x128xf32>
    %912 = arith.addf %898, %911 : vector<8x128xf32>
    %c64_150 = arith.constant 64 : index
    %913 = arith.index_cast %799 : i32 to index
    %914 = vector.load %arg5[%c64_150, %913] : memref<72x128xf32, #tpu.memory_space<vmem>>, vector<8x128xf32>
    %915 = vector.broadcast %783 : f32 to vector<8x128xf32>
    %916 = arith.mulf %915, %914 : vector<8x128xf32>
    %917 = vector.broadcast %787 : f32 to vector<8x128xf32>
    %918 = arith.addf %916, %917 : vector<8x128xf32>
    %cst_151 = arith.constant 0.000000e+00 : f32
    %919 = vector.broadcast %cst_151 : f32 to vector<8x128xf32>
    %920 = arith.cmpf ogt, %918, %919 : vector<8x128xf32>
    %cst_152 = arith.constant 0.00999999977 : f32
    %921 = vector.broadcast %cst_152 : f32 to vector<8x128xf32>
    %922 = arith.mulf %921, %918 : vector<8x128xf32>
    %923 = arith.select %920, %918, %922 : vector<8x128xi1>, vector<8x128xf32>
    %924 = vector.broadcast %796 : f32 to vector<8x128xf32>
    %925 = arith.mulf %924, %923 : vector<8x128xf32>
    %926 = arith.addf %912, %925 : vector<8x128xf32>
    %927 = vector.broadcast %797 : f32 to vector<8x128xf32>
    %928 = arith.addf %926, %927 : vector<8x128xf32>
    %c0_153 = arith.constant 0 : index
    %929 = arith.index_cast %799 : i32 to index
    %930 = vector.load %arg4[%c0_153, %929] : memref<8x128xf32, #tpu.memory_space<vmem>>, vector<8x128xf32>
    tpu.vector_store %arg4[%c0_153, %929], %928 {strides = array<i32>} : memref<8x128xf32, #tpu.memory_space<vmem>>, vector<8x128xf32>,
    %c1_i32_154 = arith.constant 1 : i32
    return
  }
  func.func @transform_0(%arg0: i32) -> i32 {
    %c0_i32 = arith.constant 0 : i32
    %c0_i32_0 = arith.constant 0 : i32
    return %c0_i32 : i32
  }
  func.func @transform_1(%arg0: i32) -> i32 {
    %c0_i32 = arith.constant 0 : i32
    %c0_i32_0 = arith.constant 0 : i32
    return %c0_i32 : i32
  }
  func.func @transform_2(%arg0: i32) -> (i32, i32) {
    %c0_i32 = arith.constant 0 : i32
    %c0_i32_0 = arith.constant 0 : i32
    %c0_i32_1 = arith.constant 0 : i32
    return %c0_i32, %c0_i32_0 : i32, i32
  }
  func.func @transform_3(%arg0: i32) -> (i32, i32) {
    %c0_i32 = arith.constant 0 : i32
    %c0_i32_0 = arith.constant 0 : i32
    %c0_i32_1 = arith.constant 0 : i32
    return %c0_i32, %c0_i32_0 : i32, i32
  }
}

</mosaic_0001>

<bundles_post_ra>
// kernel: tpu_custom_call.1
= control target key start
LH: loop header
LB: loop body
LE: loop exit
PB: predicated region body
PF: predicated region fallthrough
CT: control target
= control target key end

     0   :  { %9 = vsyncpa [#allocation7], 0  ;;  %s1812_s0 = inlined_call_operand.<no memory space> [shape: s32[1], index: 0, kind: input, shape index: {}]   ;;  %s1813_s1 = inlined_call_operand.vmem [shape: f32[67], index: 1, kind: input, shape index: {}]   ;;  %s1814_s2 = inlined_call_operand.hbm [shape: f32[40,128], index: 2, kind: input, shape index: {}]   ;;  %s1815_s3 = inlined_call_operand.hbm [shape: f32[8,128], index: 3, kind: output, shape index: {}]  }
   0x1   :  { %10 = vsyncpa [#allocation5], 0 }
   0x2   :  { %11 = vsyncpa [#allocation6], 0  ;;  %s20_s14 = sshll.u32 %s1813_s1, 4  ;;  %s21_s14 = int_to_ptr.vmem [resolvable:$true] %s20_s14 }
   0x3   :  { %s1207_s15 = scalar_lea.vmem %s21_s14, 16  ;;  %p1212_p1 = scmp.lt.s32.totalorder %s21_s14, %s21_s14 }
   0x4   :  { %p1208_p0 = scmp.ne.s32.totalorder %s21_s14, %s1207_s15  ;;  %p1213_p2 = scmp.lt.s32.totalorder %s1207_s15, %s1207_s15 }
   0x6   :  { %p1214_p3 = por %p1213_p2, %p1212_p1 }
   0x8   :  { %p1215_p4 = pnand %p1214_p3, %p1208_p0 }
   0xa   :  { %1218 = shalt.err (!%p1215_p4)
}
   0xb   :  { %s1269_s16 = smov [#allocation4]   ;;  %s1270_s17 = smov [#allocation8]  }
   0xc   :  { %23 = dma.vmem_to_smem %s21_s14, 16, %s1269_s16, [#allocation7]  }
   0xd   :  { %s29_s18 = sshll.u32 %s1270_s17, 4  ;;  %s1219_s21 = scalar_lea.hbm %s1814_s2, 640  ;;  %s30_s18 = int_to_ptr.vmem [resolvable:$true] %s29_s18 }
   0xe   :  { %p1220_p5 = scmp.ne.s32.totalorder %s1814_s2, %s1219_s21  ;;  %p1223_p6 = scmp.lt.u32.totalorder %s1219_s21, %s1814_s2 }
  0x10   :  { %p1225_p7 = pnand %p1223_p6, %p1220_p5 }
  0x12   :  { %1228 = shalt.err (!%p1225_p7)
}
  0x13   :  { %s1229_s25 = scalar_lea.vmem %s30_s18, 640  ;;  %p1234_p9 = scmp.lt.s32.totalorder %s30_s18, %s30_s18 }
  0x14   :  { %p1230_p8 = scmp.ne.s32.totalorder %s30_s18, %s1229_s25  ;;  %p1235_p10 = scmp.lt.s32.totalorder %s1229_s25, %s1229_s25 }
  0x16   :  { %p1236_p11 = por %p1235_p10, %p1234_p9 }
  0x18   :  { %p1237_p12 = pnand %p1236_p11, %p1230_p8 }
  0x1a   :  { %1240 = shalt.err (!%p1237_p12)
}
  0x1b   :  { %s1271_s26 = smov 128   ;;  %s1272_s27 = smov 8  }
  0x1c   :  { %35 = dma.hbm_to_vmem [thread:$0]  %s1814_s2, 640, %s30_s18, [#allocation5], %s1271_s26, %s1271_s26, %s1272_s27  }
  0x1d   :  { %1263 = dma.done.wait [#allocation7], 16  }
  0x1e   :  { %1264 = vsyncadd [#allocation7], 4294967280 }
  0x1f   :  { %1265 = dma.done.wait [#allocation5], 640  }
  0x20   :  { %1266 = vsyncadd [#allocation5], 4294966656 }
  0x21   :  { %42 = sfence }
  0x22   :  { %s44_s30 = sld [smem:[#allocation4]]  ;;  %s962_s4 = sld [smem:[#allocation4 + $0x2]]  ;;  %v1311_v0 = vld [vmem:[#allocation8] sm:$0xff] }
  0x23   :  { %s966_s5 = sld [smem:[#allocation4 + $0x6]]  ;;  %s967_s6 = sld [smem:[#allocation4 + $0x7]] }
  0x24   :  { %s968_s7 = sld [smem:[#allocation4 + $0x8]]  ;;  %s970_s8 = sld [smem:[#allocation4 + $0xa]] }
  0x25   :  { %s971_s9 = sld [smem:[#allocation4 + $0xb]]  ;;  %s978_s10 = sld [smem:[#allocation4 + $0x12]] }
  0x26   :  { %s980_s11 = sld [smem:[#allocation4 + $0x14]]  ;;  %s984_s12 = sld [smem:[#allocation4 + $0x18]] }
  0x27   :  { %s986_s2 = sld [smem:[#allocation4 + $0x1a]]  ;;  %s969_s13 = sld [smem:[#allocation4 + $0x9]] }
  0x28   :  { %v1313_v1 = vstv %s44_s30  ;;  %v1317_v3 = vstv %s962_s4  ;;  %s972_s14 = sld [smem:[#allocation4 + $0xc]]  ;;  %s973_s15 = sld [smem:[#allocation4 + $0xd]] }
  0x29   :  { %v1315_v2 = vstv %s966_s5  ;;  %v1320_v5 = vstv %s967_s6  ;;  %v109_v6 = vmul.f32 %v1313_v1, %v1311_v0  ;;  %v120_v12 = vmul.f32 %v1317_v3, %v1311_v0  ;;  %s961_s16 = sld [smem:[#allocation4 + $0x1]]  ;;  %s1342_s17 = sld [smem:[#allocation4 + $0x3]] }
  0x2a   :  { %v88_v4 = vmul.f32 0.0, %v1315_v2  ;;  %v90_v7 = vmul.f32 0.0, %v1320_v5  ;;  %v1325_v8 = vstv %s970_s8  ;;  %v1335_v15 = vstv %s968_s7  ;;  %s979_s18 = sld [smem:[#allocation4 + $0x13]]  ;;  %s985_s19 = sld [smem:[#allocation4 + $0x19]] }
  0x2b   :  { %v1327_v9 = vstv %s971_s9  ;;  %v95_v10 = vmul.f32 0.0, %v1325_v8  ;;  %v1333_v14 = vstv %s978_s10  ;;  %s981_s20 = sld [smem:[#allocation4 + $0x15]]  ;;  %s987_s21 = sld [smem:[#allocation4 + $0x1b]]  ;;  %v131_v25 = vmul.f32 0.0, %v1335_v15 }
  0x2c   :  { %v97_v11 = vmul.f32 0.0, %v1327_v9  ;;  %v91_v13 = vadd.f32 %v90_v7, %v88_v4  ;;  %v1337_v16 = vstv %s984_s12  ;;  %v111_v18 = vadd.f32 %v1333_v14, %v109_v6  ;;  %s974_s22 = sld [smem:[#allocation4 + $0xe]]  ;;  %s975_s23 = sld [smem:[#allocation4 + $0xf]] }
  0x2d   :  { %v1340_v19 = vstv %s980_s11  ;;  %v1345_v21 = vstv %s986_s2  ;;  %v1350_v26 = vstv %s969_s13  ;;  %s964_s1 = sld [smem:[#allocation4 + $0x4]]  ;;  %s982_s25 = sld [smem:[#allocation4 + $0x16]] }
  0x2e   :  { %v98_v17 = vadd.f32 %v97_v11, %v95_v10  ;;  %v93_v20 = vadd.f32 %v1337_v16, %v91_v13  ;;  %v122_v23 = vadd.f32 %v1340_v19, %v120_v12  ;;  %v133_v28 = vmul.f32 0.0, %v1350_v26  ;;  %s988_s24 = sld [smem:[#allocation4 + $0x1c]]  ;;  %s976_s26 = sld [smem:[#allocation4 + $0x10]] }
  0x2f   :  { %v1353_v29 = vstv %s972_s14  ;;  %v1356_v32 = vstv %s973_s15  ;;  %v1361_v36 = vstv %s961_s16  ;;  %v1371_v43 = vstv %s1342_s17  ;;  %s977_s27 = sld [smem:[#allocation4 + $0x11]]  ;;  %s965_s28 = sld [smem:[#allocation4 + $0x5]] }
  0x30   :  { %v100_v22 = vadd.f32 %v1345_v21, %v98_v17  ;;  %v112_v24 = vadd.f32 %v111_v18, %v93_v20  ;;  %v138_v31 = vmul.f32 0.0, %v1353_v29  ;;  %v134_v33 = vadd.f32 %v133_v28, %v131_v25  ;;  %s989_s29 = sld [smem:[#allocation4 + $0x1d]]  ;;  %s983_s30 = sld [smem:[#allocation4 + $0x17]] }
  0x31   :  { %v140_v34 = vmul.f32 0.0, %v1356_v32  ;;  %v1359_v35 = vstv %s985_s19  ;;  %v1363_v39 = vstv %s987_s21  ;;  %v152_v41 = vmul.f32 %v1361_v36, %v1311_v0  ;;  %s451_s8 = scvt.s32.f32 %s1812_s0  ;;  %s1274_s19 = smov 0.0  }
  0x32   :  { %v123_v27 = vadd.f32 %v122_v23, %v100_v22  ;;  %v991_v30 = vmul.f32 -1.442695, %v112_v24  ;;  %v136_v40 = vadd.f32 %v1359_v35, %v134_v33  ;;  %v1368_v42 = vstv %s979_s18 }
  0x33   :  { %v141_v38 = vadd.f32 %v140_v34, %v138_v31  ;;  %v1373_v44 = vstv %s981_s20  ;;  %v154_v46 = vadd.f32 %v1368_v42, %v152_v41  ;;  %v163_v47 = vmul.f32 %v1371_v43, %v1311_v0 }
  0x34   :  { %1107 = vpow2.f32 %v991_v30  ;;  %v992_v37 = vmul.f32 -1.442695, %v123_v27  ;;  %v1380_v52 = vstv %s974_s22  ;;  %v1382_v53 = vstv %s975_s23  ;;  %s1602_s22 = sld [smem:[#allocation4 + $0x31]] }
  0x35   :  { %v143_v45 = vadd.f32 %v1363_v39, %v141_v38  ;;  %v155_v48 = vadd.f32 %v154_v46, %v136_v40  ;;  %v165_v49 = vadd.f32 %v1373_v44, %v163_v47  ;;  %v102_v57 = vmul.f32 0.0, %v1380_v52 }
  0x36   :  { %1109 = vpow2.f32 %v992_v37  ;;  %v104_v58 = vmul.f32 0.0, %v1382_v53  ;;  %v1386_v60 = vstv %s964_s1  ;;  %v1388_v62 = vstv %s988_s24 }
  0x37   :  { %v993_v50 = vmul.f32 -1.442695, %v155_v48  ;;  %v166_v51 = vadd.f32 %v165_v49, %v143_v45  ;;  %v174_v4 = vmul.f32 %v1386_v60, %v1311_v0  ;;  %v1392_v6 = vstv %s982_s25 }
  0x38   :  { %v105_v61 = vadd.f32 %v104_v58, %v102_v57  ;;  %v1394_v7 = vstv %s976_s26  ;;  %v1396_v10 = vstv %s977_s27  ;;  %v74_v13 = vlaneseq }
  0x39   :  { %1111 = vpow2.f32 %v993_v50  ;;  %v994_v56 = vmul.f32 -1.442695, %v166_v51  ;;  %v176_v18 = vadd.f32 %v1392_v6, %v174_v4  ;;  %v145_v20 = vmul.f32 0.0, %v1394_v7 }
  0x3a   :  { %v107_v12 = vadd.f32 %v1388_v62, %v105_v61  ;;  %v147_v22 = vmul.f32 0.0, %v1396_v10  ;;  %v75_v27 = vshrl.u32 %v74_v13, 7  ;;  %v1402_v28 = vstv %s965_s28  ;;  %s524_s23 = smul.f32 2.0, %s1602_s22 }
  0x3b   :  { %v1404_v33 = vstv %s989_s29  ;;  %v187_v37 = vmul.f32 %v1402_v28, %v1311_v0  ;;  %v77_v38 = vand.u32 127, %v74_v13  ;;  %v1408_v41 = vstv %s983_s30  ;;  %s525_s1 = smul.f32 %s1602_s22, %s1602_s22 }
  0x3c   :  { %v148_v31 = vadd.f32 %v147_v22, %v145_v20  ;;  %v78_v40 = vmul.u32 128, %v75_v27  ;;  %v82_v50 = vstv %s1812_s0  ;;  %v1273_v58 = vmov 0.0   ;;  %s1552_s0 = sld [smem:[#allocation4 + $0x30]] }
  0x3d   :  { %v189_v47 = vadd.f32 %v1408_v41, %v187_v37  ;;  %s526_s25 = ssub.f32 %s524_s23, %s525_s1 }
  0x3e   :  { %v1108_v54 = vpop.eup %1107  ;;  %v150_v45 = vadd.f32 %v1404_v33, %v148_v31  ;;  %v81_v49 = vadd.s32 %v78_v40, %v77_v38 }
  0x3f   :  { %v116_v55 = vadd.f32 1.0, %v1108_v54 }
  0x40   :  { %v1110_v59 = vpop.eup %1109  ;;  %vm83_vm0 = vcmp.lt.s32.totalorder %v81_v49, %v82_v50  ;;  %v452_v50 = vstv %s451_s8  ;;  %s1007_s8 = sld [smem:[#allocation4 + $0x1e]] }
  0x41   :  { %1113 = vrcp.f32 %v116_v55  ;;  %v127_v63 = vadd.f32 1.0, %v1110_v59  ;;  %v1415_v59 = vsel %vm83_vm0, 1.0, %v1273_v58 }
  0x42   :  { %1115 = vpow2.f32 %v994_v56  ;;  %s482_s9 = smul.f32 2.0, %s1552_s0 }
  0x43   :  { %v1112_v11 = vpop.eup %1111  ;;  %1117 = vrcp.f32 %v127_v63  ;;  %s483_s10 = smul.f32 %s1552_s0, %s1552_s0 }
  0x44   :  { %v159_v17 = vadd.f32 1.0, %v1112_v11 }
  0x45   :  { %s484_s12 = ssub.f32 %s482_s9, %s483_s10  ;;  %s1648_s10 = sld [smem:[#allocation4 + $0x32]] }
  0x46   :  { %1119 = vrcp.f32 %v159_v17 }
  0x4b   :  { %v1114_v23 = vpop.eup %1113 }
  0x4c   :  { %v177_v24 = vmul.f32 %v1114_v23, %v107_v12  ;;  %v1116_v25 = vpop.eup %1115 }
  0x4d   :  { %v170_v34 = vadd.f32 1.0, %v1116_v25  ;;  %v1118_v46 = vpop.eup %1117 }
  0x4e   :  { %v178_v30 = vadd.f32 %v177_v24, %v176_v18  ;;  %v180_v54 = vsub.f32 1.0, %v1118_v46  ;;  %v182_v0 = vmul.f32 0.0, %v1118_v46  ;;  %v1426_v18 = vld [vmem:[#allocation8 + $0x8] sm:$0xff] }
  0x4f   :  { %v212_v25 = vmul.f32 %v1426_v18, %v1313_v1  ;;  %v221_v27 = vmul.f32 %v1426_v18, %v1317_v3 }
  0x50   :  { %1121 = vtanh.f32 %v178_v30  ;;  %v1120_v48 = vpop.eup %1119 }
  0x51   :  { %1123 = vrcp.f32 %v170_v34  ;;  %v190_v51 = vmul.f32 %v1120_v48, %v150_v45  ;;  %v213_v45 = vadd.f32 %v212_v25, %v1333_v14  ;;  %v222_v46 = vadd.f32 %v221_v27, %v1340_v19 }
  0x53   :  { %v191_v55 = vadd.f32 %v190_v51, %v189_v47 }
  0x55   :  { %1125 = vtanh.f32 %v191_v55 }
  0x56   :  { %1127 = vrcp.f32 %v452_v50 }
  0x5a   :  { %v1122_v56 = vpop.eup %1121 }
  0x5b   :  { %v181_v57 = vmul.f32 %v1122_v56, %v180_v54  ;;  %v1124_v63 = vpop.eup %1123 }
  0x5c   :  { %v193_v12 = vsub.f32 1.0, %v1124_v63  ;;  %v195_v13 = vmul.f32 0.0, %v1124_v63 }
  0x5d   :  { %v1417_v61 = vadd.f32 %v182_v0, %v181_v57 }
  0x5f   :  { %v1421_v4 = vmul.f32 %v1415_v59, %v1417_v61  ;;  %v1126_v17 = vpop.eup %1125  ;;  %v200_v22 = vmul.f32 %v1417_v61, %v1315_v2  ;;  %v204_v24 = vmul.f32 %v1417_v61, %v1325_v8  ;;  %v230_v56 = vmul.f32 %v1417_v61, %v1335_v15 }
  0x60   :  { %v194_v20 = vmul.f32 %v1126_v17, %v193_v12  ;;  %v1128_v0 = vpop.eup %1127 }
  0x61   :  { %456 = vadd.xlane.f32.xlu0 %v1421_v4  ;;  %v466_v11 = vmul.f32 %v1421_v4, %v1421_v4  ;;  %1044 = vpush %v1128_v0 }
  0x62   :  { %v1430_v23 = vadd.f32 %v195_v13, %v194_v20  ;;  %v242_v20 = vmul.f32 %v1426_v18, %v1361_v36 }
  0x64   :  { %v1440_v30 = vmul.f32 %v1415_v59, %v1430_v23  ;;  %v201_v31 = vmul.f32 %v1430_v23, %v1320_v5  ;;  %v205_v34 = vmul.f32 %v1430_v23, %v1327_v9  ;;  %v231_v57 = vmul.f32 %v1430_v23, %v1350_v26 }
  0x65   :  { %467 = vadd.xlane.f32.xlu0 %v466_v11  ;;  %v208_v11 = vmul.f32 %v1417_v61, %v1380_v52  ;;  %v209_v12 = vmul.f32 %v1430_v23, %v1382_v53  ;;  %v243_v25 = vadd.f32 %v242_v20, %v1368_v42 }
  0x66   :  { %498 = vadd.xlane.f32.xlu1 %v1440_v30  ;;  %v202_v37 = vadd.f32 %v201_v31, %v200_v22  ;;  %v508_v38 = vmul.f32 %v1440_v30, %v1440_v30  ;;  %v206_v40 = vadd.f32 %v205_v34, %v204_v24  ;;  %v232_v13 = vadd.f32 %v231_v57, %v230_v56 }
  0x67   :  { %v210_v22 = vadd.f32 %v209_v12, %v208_v11  ;;  %v260_v31 = vmul.f32 %v1426_v18, %v1386_v60 }
  0x68   :  { %v203_v47 = vadd.f32 %v202_v37, %v1337_v16  ;;  %v207_v48 = vadd.f32 %v206_v40, %v1345_v21  ;;  %v233_v24 = vadd.f32 %v232_v13, %v1359_v35 }
  0x69   :  { %v211_v37 = vadd.f32 %v210_v22, %v1388_v62  ;;  %v261_v40 = vadd.f32 %v260_v31, %v1392_v6  ;;  %v238_v22 = vmul.f32 %v1417_v61, %v1394_v7 }
  0x6a   :  { %509 = vadd.xlane.f32.xlu1 %v508_v38  ;;  %v214_v49 = vadd.f32 %v213_v45, %v203_v47  ;;  %v223_v51 = vadd.f32 %v222_v46, %v207_v48  ;;  %v244_v34 = vadd.f32 %v243_v25, %v233_v24  ;;  %v234_v48 = vmul.f32 %v1417_v61, %v1353_v29 }
  0x6b   :  { %v239_v24 = vmul.f32 %v1430_v23, %v1396_v10 }
  0x6c   :  { %v995_v54 = vmul.f32 -1.442695, %v214_v49  ;;  %v996_v55 = vmul.f32 -1.442695, %v223_v51  ;;  %v997_v38 = vmul.f32 -1.442695, %v244_v34  ;;  %v235_v49 = vmul.f32 %v1430_v23, %v1356_v32 }
  0x6d   :  { %v251_v51 = vmul.f32 %v1426_v18, %v1371_v43 }
  0x6e   :  { %1129 = vpow2.f32 %v995_v54  ;;  %v236_v50 = vadd.f32 %v235_v49, %v234_v48 }
  0x6f   :  { %1131 = vpow2.f32 %v996_v55  ;;  %v252_v55 = vadd.f32 %v251_v51, %v1373_v44 }
  0x70   :  { %v237_v54 = vadd.f32 %v236_v50, %v1363_v39 }
  0x72   :  { %v253_v56 = vadd.f32 %v252_v55, %v237_v54 }
  0x78   :  { %v1130_v58 = vpop.eup %1129 }
  0x79   :  { %v218_v63 = vadd.f32 1.0, %v1130_v58  ;;  %v1132_v17 = vpop.eup %1131 }
  0x7a   :  { %v227_v27 = vadd.f32 1.0, %v1132_v17 }
  0x7b   :  { %1133 = vrcp.f32 %v218_v63  ;;  %v998_v63 = vmul.f32 -1.442695, %v253_v56 }
  0x7c   :  { %1135 = vrcp.f32 %v227_v27  ;;  %v240_v27 = vadd.f32 %v239_v24, %v238_v22 }
  0x7d   :  { %1137 = vpow2.f32 %v997_v38 }
  0x7e   :  { %v241_v34 = vadd.f32 %v240_v27, %v1404_v33 }
  0x85   :  { %v1134_v45 = vpop.eup %1133 }
  0x86   :  { %v262_v46 = vmul.f32 %v1134_v45, %v211_v37  ;;  %v1136_v0 = vpop.eup %1135  ;;  %v271_v37 = vmul.f32 %v1426_v18, %v1402_v28 }
  0x87   :  { %v1138_v57 = vpop.eup %1137  ;;  %v265_v11 = vsub.f32 1.0, %v1136_v0  ;;  %v267_v12 = vmul.f32 %v1136_v0, %v1417_v61 }
  0x88   :  { %v263_v47 = vadd.f32 %v262_v46, %v261_v40  ;;  %v248_v58 = vadd.f32 1.0, %v1138_v57  ;;  %v272_v40 = vadd.f32 %v271_v37, %v1408_v41 }
  0x8a   :  { %1139 = vtanh.f32 %v263_v47 }
  0x8b   :  { %1141 = vrcp.f32 %v248_v58  ;;  %v1512_v58 = vld [vmem:[#allocation8 + $0x10] sm:$0xff] }
  0x8c   :  { %1143 = vpow2.f32 %v998_v63  ;;  %v295_v63 = vmul.f32 %v1512_v58, %v1313_v1 }
  0x92   :  { %s1563_s11 = spop %1044 }
  0x94   :  { %v1140_v13 = vpop.eup %1139 }
  0x95   :  { %v266_v17 = vmul.f32 %v1140_v13, %v265_v11  ;;  %v1142_v38 = vpop.eup %1141 }
  0x96   :  { %v1144_v61 = vpop.eup %1143  ;;  %v273_v45 = vmul.f32 %v1142_v38, %v241_v34 }
  0x97   :  { %v1481_v20 = vadd.f32 %v267_v12, %v266_v17  ;;  %v257_v46 = vadd.f32 1.0, %v1144_v61  ;;  %v296_v12 = vadd.f32 %v295_v63, %v1333_v14 }
  0x98   :  { %v274_v47 = vadd.f32 %v273_v45, %v272_v40 }
  0x99   :  { %v1489_v25 = vmul.f32 %v1415_v59, %v1481_v20  ;;  %1145 = vrcp.f32 %v257_v46  ;;  %v283_v56 = vmul.f32 %v1481_v20, %v1315_v2  ;;  %v287_v22 = vmul.f32 %v1481_v20, %v1325_v8 }
  0x9a   :  { %1147 = vtanh.f32 %v274_v47  ;;  %v291_v46 = vmul.f32 %v1481_v20, %v1380_v52 }
  0x9b   :  { %540 = vadd.xlane.f32.xlu0 %v1489_v25  ;;  %v550_v31 = vmul.f32 %v1489_v25, %v1489_v25 }
  0x9d   :  { %551 = vadd.xlane.f32.xlu1 %v550_v31  ;;  %v304_v31 = vmul.f32 %v1512_v58, %v1317_v3 }
  0x9f   :  { %v305_v37 = vadd.f32 %v304_v31, %v1340_v19 }
  0xa3   :  { %v1146_v48 = vpop.eup %1145 }
  0xa4   :  { %v1148_v49 = vpop.eup %1147  ;;  %v276_v50 = vsub.f32 1.0, %v1146_v48  ;;  %v278_v51 = vmul.f32 %v1146_v48, %v1430_v23 }
  0xa6   :  { %v277_v54 = vmul.f32 %v1148_v49, %v276_v50 }
  0xa8   :  { %v1499_v55 = vadd.f32 %v278_v51, %v277_v54  ;;  %v343_v51 = vmul.f32 %v1512_v58, %v1386_v60 }
  0xaa   :  { %v1503_v18 = vmul.f32 %v1415_v59, %v1499_v55  ;;  %v284_v57 = vmul.f32 %v1499_v55, %v1320_v5  ;;  %v288_v24 = vmul.f32 %v1499_v55, %v1327_v9  ;;  %v292_v47 = vmul.f32 %v1499_v55, %v1382_v53 }
  0xac   :  { %582 = vadd.xlane.f32.xlu0 %v1503_v18  ;;  %v592_v0 = vmul.f32 %v1503_v18, %v1503_v18  ;;  %v285_v23 = vadd.f32 %v284_v57, %v283_v56  ;;  %v289_v27 = vadd.f32 %v288_v24, %v287_v22  ;;  %v293_v48 = vadd.f32 %v292_v47, %v291_v46 }
  0xad   :  { %v344_v57 = vadd.f32 %v343_v51, %v1392_v6 }
  0xae   :  { %593 = vadd.xlane.f32.xlu1 %v592_v0  ;;  %v286_v11 = vadd.f32 %v285_v23, %v1337_v16  ;;  %v290_v34 = vadd.f32 %v289_v27, %v1345_v21  ;;  %v294_v50 = vadd.f32 %v293_v48, %v1388_v62 }
  0xb0   :  { %v297_v13 = vadd.f32 %v296_v12, %v286_v11  ;;  %v306_v38 = vadd.f32 %v305_v37, %v290_v34 }
  0xb2   :  { %v999_v17 = vmul.f32 -1.442695, %v297_v13  ;;  %v1000_v45 = vmul.f32 -1.442695, %v306_v38 }
  0xb4   :  { %1149 = vpow2.f32 %v999_v17 }
  0xbe   :  { %v1150_v61 = vpop.eup %1149 }
  0xbf   :  { %v301_v40 = vadd.f32 1.0, %v1150_v61 }
  0xc1   :  { %1151 = vrcp.f32 %v301_v40 }
  0xc2   :  { %1153 = vpow2.f32 %v1000_v45 }
  0xcb   :  { %v1152_v54 = vpop.eup %1151 }
  0xcc   :  { %v1154_v56 = vpop.eup %1153  ;;  %v345_v23 = vmul.f32 %v1152_v54, %v294_v50 }
  0xcd   :  { %v310_v11 = vadd.f32 1.0, %v1154_v56  ;;  %v314_v56 = vmul.f32 %v1499_v55, %v1350_v26 }
  0xce   :  { %v346_v13 = vadd.f32 %v345_v23, %v344_v57  ;;  %v325_v23 = vmul.f32 %v1512_v58, %v1361_v36 }
  0xcf   :  { %1155 = vrcp.f32 %v310_v11 }
  0xd0   :  { %1157 = vtanh.f32 %v346_v13  ;;  %v326_v11 = vadd.f32 %v325_v23, %v1368_v42 }
  0xd9   :  { %v1156_v40 = vpop.eup %1155 }
  0xda   :  { %v1158_v46 = vpop.eup %1157  ;;  %v348_v47 = vsub.f32 1.0, %v1156_v40  ;;  %v350_v48 = vmul.f32 %v1156_v40, %v1481_v20 }
  0xee   :  { %v457_v49 = vpop.xlane.xlu0 %456 }
  0xef   :  { %v458_v0 = vrot.slane %v457_v49, 4 }
  0xf1   :  { %v459_v63 = vadd.f32 %v458_v0, %v457_v49  ;;  %v349_v49 = vmul.f32 %v1158_v46, %v348_v47  ;;  %v313_v0 = vmul.f32 %v1481_v20, %v1335_v15 }
  0xf2   :  { %v468_v12 = vpop.xlane.xlu0 %467 }
  0xf3   :  { %v460_v17 = vrot.slane %v459_v63, 2  ;;  %v469_v22 = vrot.slane %v468_v12, 4  ;;  %v1535_v50 = vadd.f32 %v350_v48, %v349_v49  ;;  %v315_v57 = vadd.f32 %v314_v56, %v313_v0 }
  0xf4   :  { %v321_v0 = vmul.f32 %v1481_v20, %v1394_v7  ;;  %v322_v56 = vmul.f32 %v1499_v55, %v1396_v10 }
  0xf5   :  { %v470_v24 = vadd.f32 %v469_v22, %v468_v12  ;;  %v461_v27 = vadd.f32 %v460_v17, %v459_v63  ;;  %v1539_v51 = vmul.f32 %v1415_v59, %v1535_v50  ;;  %v316_v63 = vadd.f32 %v315_v57, %v1359_v35 }
  0xf6   :  { %v317_v17 = vmul.f32 %v1481_v20, %v1353_v29  ;;  %v318_v22 = vmul.f32 %v1499_v55, %v1356_v32  ;;  %v323_v57 = vadd.f32 %v322_v56, %v321_v0 }
  0xf7   :  { %v471_v31 = vrot.slane %v470_v24, 2  ;;  %v462_v34 = vrot.slane %v461_v27, 1  ;;  %624 = vadd.xlane.f32.xlu0 %v1539_v51  ;;  %v634_v54 = vmul.f32 %v1539_v51, %v1539_v51  ;;  %v327_v12 = vadd.f32 %v326_v11, %v316_v63 }
  0xf9   :  { %v463_v37 = vadd.f32 %v462_v34, %v461_v27  ;;  %v472_v38 = vadd.f32 %v471_v31, %v470_v24  ;;  %635 = vadd.xlane.f32.xlu1 %v634_v54  ;;  %v1001_v13 = vmul.f32 -1.442695, %v327_v12  ;;  %v499_v24 = vpop.xlane.xlu1 %498  ;;  %v319_v27 = vadd.f32 %v318_v22, %v317_v17 }
  0xfa   :  { %v334_v31 = vmul.f32 %v1512_v58, %v1371_v43  ;;  %v500_v47 = vrot.slane %v499_v24, 4  ;;  %v324_v12 = vadd.f32 %v323_v57, %v1404_v33 }
  0xfb   :  { %1046 = vpush %v463_v37  ;;  %v473_v61 = vrot.slane %v472_v38, 1  ;;  %1159 = vpow2.f32 %v1001_v13  ;;  %v320_v34 = vadd.f32 %v319_v27, %v1363_v39  ;;  %v354_v13 = vmul.f32 %v1512_v58, %v1402_v28 }
  0xfc   :  { %v335_v37 = vadd.f32 %v334_v31, %v1373_v44  ;;  %v501_v49 = vadd.f32 %v500_v47, %v499_v24 }
  0xfd   :  { %v474_v45 = vadd.f32 %v473_v61, %v472_v38  ;;  %v510_v40 = vpop.xlane.xlu1 %509  ;;  %v355_v20 = vadd.f32 %v354_v13, %v1408_v41 }
  0xfe   :  { %v336_v38 = vadd.f32 %v335_v37, %v320_v34  ;;  %v511_v48 = vrot.slane %v510_v40, 4  ;;  %v502_v23 = vrot.slane %v501_v49, 2 }
  0xff   :  { %1048 = vpush %v474_v45 }
 0x100   :  { %v1002_v46 = vmul.f32 -1.442695, %v336_v38  ;;  %v512_v54 = vadd.f32 %v511_v48, %v510_v40  ;;  %v503_v27 = vadd.f32 %v502_v23, %v501_v49  ;;  %v366_v23 = vmul.f32 %v1535_v50, %v1315_v2 }
 0x102   :  { %v513_v11 = vrot.slane %v512_v54, 2  ;;  %v504_v38 = vrot.slane %v503_v27, 1 }
 0x104   :  { %v514_v34 = vadd.f32 %v513_v11, %v512_v54 }
 0x105   :  { %v1160_v61 = vpop.eup %1159 }
 0x106   :  { %v331_v45 = vadd.f32 1.0, %v1160_v61  ;;  %v515_v61 = vrot.slane %v514_v34, 1 }
 0x108   :  { %1161 = vrcp.f32 %v331_v45  ;;  %v505_v45 = vadd.f32 %v504_v38, %v503_v27 }
 0x109   :  { %1163 = vpow2.f32 %v1002_v46  ;;  %v516_v46 = vadd.f32 %v515_v61, %v514_v34  ;;  %v374_v61 = vmul.f32 %v1535_v50, %v1380_v52 }
 0x112   :  { %v1162_v17 = vpop.eup %1161 }
 0x113   :  { %v1164_v22 = vpop.eup %1163  ;;  %v356_v24 = vmul.f32 %v1162_v17, %v324_v12 }
 0x114   :  { %v340_v31 = vadd.f32 1.0, %v1164_v22 }
 0x115   :  { %v357_v37 = vadd.f32 %v356_v24, %v355_v20 }
 0x12c   :  { %s1047_s2 = spop %1046 }
 0x12d   :  { %s1568_s13 = smul.f32 %s1047_s2, %s1563_s11 }
 0x12f   :  { %s485_s14 = smul.f32 %s484_s12, %s1568_s13  ;;  %s1008_s12 = sld [smem:[#allocation4 + $0x27]] }
 0x130   :  { %s1049_s15 = spop %1048 }
 0x131   :  { %s478_s16 = smul.f32 %s1049_s15, %s1563_s11  ;;  %s1010_s15 = sld [smem:[#allocation4 + $0x1f]] }
 0x132   :  { %s486_s17 = smul.f32 %s485_s14, %s1568_s13 }
 0x134   :  { %s487_s18 = ssub.f32 %s478_s16, %s486_s17  ;;  %s566_s16 = smul.f32 2.0, %s1648_s10 }
 0x135   :  { %s567_s17 = smul.f32 %s1648_s10, %s1648_s10 }
 0x136   :  { %s488_s20 = smax.f32 %s1274_s19, %s487_s18 }
 0x137   :  { %s489_s21 = sadd.f32 1e-05, %s488_s20 }
 0x139   :  { %v490_v63 = vstv %s489_s21  ;;  %s568_s21 = ssub.f32 %s566_s16, %s567_s17 }
 0x13a   :  { %1165 = vrsqrt.f32 %v490_v63 }
 0x13b   :  { %1167 = vrcp.f32 %v340_v31  ;;  %v552_v31 = vpop.xlane.xlu1 %551 }
 0x13c   :  { %1169 = vtanh.f32 %v357_v37 }
 0x144   :  { %v1166_v40 = vpop.eup %1165 }
 0x145   :  { %1050 = vpush %v1166_v40  ;;  %v1168_v58 = vpop.eup %1167 }
 0x146   :  { %1052 = vpush %v505_v45  ;;  %v1170_v47 = vpop.eup %1169  ;;  %v359_v48 = vsub.f32 1.0, %v1168_v58  ;;  %v361_v0 = vmul.f32 %v1168_v58, %v1499_v55  ;;  %v1596_v55 = vld [vmem:[#allocation8 + $0x18] sm:$0xff] }
 0x147   :  { %1054 = vpush %v516_v46  ;;  %v378_v12 = vmul.f32 %v1596_v55, %v1313_v1 }
 0x148   :  { %v360_v56 = vmul.f32 %v1170_v47, %v359_v48 }
 0x149   :  { %v379_v17 = vadd.f32 %v378_v12, %v1333_v14  ;;  %v387_v14 = vmul.f32 %v1596_v55, %v1317_v3 }
 0x14a   :  { %v1583_v49 = vadd.f32 %v361_v0, %v360_v56  ;;  %v426_v0 = vmul.f32 %v1596_v55, %v1386_v60 }
 0x14b   :  { %v388_v24 = vadd.f32 %v387_v14, %v1340_v19  ;;  %v553_v19 = vrot.slane %v552_v31, 4 }
 0x14c   :  { %v1587_v54 = vmul.f32 %v1415_v59, %v1583_v49  ;;  %v367_v63 = vmul.f32 %v1583_v49, %v1320_v5  ;;  %v370_v5 = vmul.f32 %v1535_v50, %v1325_v8  ;;  %v371_v20 = vmul.f32 %v1583_v49, %v1327_v9  ;;  %v541_v9 = vpop.xlane.xlu0 %540 }
 0x14d   :  { %v554_v38 = vadd.f32 %v553_v19, %v552_v31  ;;  %v375_v40 = vmul.f32 %v1583_v49, %v1382_v53  ;;  %v427_v52 = vadd.f32 %v426_v0, %v1392_v6  ;;  %v408_v31 = vmul.f32 %v1596_v55, %v1361_v36 }
 0x14e   :  { %666 = vadd.xlane.f32.xlu0 %v1587_v54  ;;  %v676_v57 = vmul.f32 %v1587_v54, %v1587_v54  ;;  %v368_v11 = vadd.f32 %v367_v63, %v366_v23  ;;  %v372_v1 = vadd.f32 %v371_v20, %v370_v5 }
 0x14f   :  { %v376_v45 = vadd.f32 %v375_v40, %v374_v61  ;;  %v555_v47 = vrot.slane %v554_v38, 2 }
 0x150   :  { %677 = vadd.xlane.f32.xlu1 %v676_v57  ;;  %v369_v13 = vadd.f32 %v368_v11, %v1337_v16  ;;  %v373_v16 = vadd.f32 %v372_v1, %v1345_v21  ;;  %v542_v21 = vrot.slane %v541_v9, 4 }
 0x151   :  { %v377_v48 = vadd.f32 %v376_v45, %v1388_v62  ;;  %v556_v11 = vadd.f32 %v555_v47, %v554_v38 }
 0x152   :  { %v380_v22 = vadd.f32 %v379_v17, %v369_v13  ;;  %v389_v27 = vadd.f32 %v388_v24, %v373_v16  ;;  %v543_v37 = vadd.f32 %v542_v21, %v541_v9 }
 0x153   :  { %v557_v17 = vrot.slane %v556_v11, 1 }
 0x154   :  { %v1003_v2 = vmul.f32 -1.442695, %v380_v22  ;;  %v1004_v3 = vmul.f32 -1.442695, %v389_v27  ;;  %v544_v46 = vrot.slane %v543_v37, 2  ;;  %v396_v27 = vmul.f32 %v1535_v50, %v1335_v15 }
 0x155   :  { %v558_v62 = vadd.f32 %v557_v17, %v556_v11 }
 0x156   :  { %1171 = vpow2.f32 %v1003_v2  ;;  %v545_v63 = vadd.f32 %v544_v46, %v543_v37 }
 0x158   :  { %v546_v13 = vrot.slane %v545_v63, 1 }
 0x15a   :  { %v547_v2 = vadd.f32 %v546_v13, %v545_v63  ;;  %v404_v63 = vmul.f32 %v1535_v50, %v1394_v7  ;;  %v437_v7 = vmul.f32 %v1596_v55, %v1402_v28 }
 0x160   :  { %v1172_v8 = vpop.eup %1171 }
 0x161   :  { %v384_v34 = vadd.f32 1.0, %v1172_v8  ;;  %v397_v8 = vmul.f32 %v1583_v49, %v1350_v26  ;;  %v400_v26 = vmul.f32 %v1535_v50, %v1353_v29 }
 0x163   :  { %1173 = vrcp.f32 %v384_v34  ;;  %v398_v9 = vadd.f32 %v397_v8, %v396_v27 }
 0x164   :  { %1175 = vpow2.f32 %v1004_v3  ;;  %v409_v3 = vadd.f32 %v408_v31, %v1368_v42  ;;  %v417_v42 = vmul.f32 %v1596_v55, %v1371_v43 }
 0x165   :  { %v399_v34 = vadd.f32 %v398_v9, %v1359_v35  ;;  %v401_v35 = vmul.f32 %v1583_v49, %v1356_v32 }
 0x166   :  { %v418_v29 = vadd.f32 %v417_v42, %v1373_v44  ;;  %v594_v44 = vpop.xlane.xlu1 %593 }
 0x167   :  { %v410_v21 = vadd.f32 %v409_v3, %v399_v34  ;;  %v402_v36 = vadd.f32 %v401_v35, %v400_v26 }
 0x169   :  { %v1005_v15 = vmul.f32 -1.442695, %v410_v21  ;;  %v403_v37 = vadd.f32 %v402_v36, %v1363_v39  ;;  %v583_v39 = vpop.xlane.xlu0 %582 }
 0x16a   :  { %v584_v47 = vrot.slane %v583_v39, 4 }
 0x16b   :  { %v419_v38 = vadd.f32 %v418_v29, %v403_v37 }
 0x16d   :  { %v1174_v56 = vpop.eup %1173  ;;  %v1006_v45 = vmul.f32 -1.442695, %v419_v38 }
 0x16e   :  { %v1176_v57 = vpop.eup %1175  ;;  %v428_v23 = vmul.f32 %v1174_v56, %v377_v48 }
 0x16f   :  { %v393_v53 = vadd.f32 1.0, %v1176_v57  ;;  %v585_v57 = vadd.f32 %v584_v47, %v583_v39 }
 0x170   :  { %v429_v12 = vadd.f32 %v428_v23, %v427_v52 }
 0x176   :  { %s1615_s24 = spop %1050 }
 0x177   :  { %s1053_s26 = spop %1052  ;;  %s493_s9 = smul.f32 %s1615_s24, %s1007_s8 }
 0x178   :  { %s1618_s27 = smul.f32 %s1053_s26, %s1563_s11  ;;  %s1055_s28 = spop %1054 }
 0x179   :  { %s520_s30 = smul.f32 %s1055_s28, %s1563_s11  ;;  %v844_v19 = vstv %s493_s9  ;;  %s1668_s24 = sld [smem:[#allocation4 + $0x3a]] }
 0x17a   :  { %s527_s29 = smul.f32 %s526_s25, %s1618_s27  ;;  %v845_v43 = vmul.f32 %v844_v19, %v1421_v4  ;;  %v595_v4 = vrot.slane %v594_v44, 4  ;;  %s1700_s8 = sld [smem:[#allocation4 + $0x33]] }
 0x17b   :  { %s494_s2 = smul.f32 %s1552_s0, %s493_s9  ;;  %s1661_s0 = sld [smem:[#allocation4 + $0x39]] }
 0x17c   :  { %s528_s4 = smul.f32 %s527_s29, %s1618_s27  ;;  %v596_v52 = vadd.f32 %v595_v4, %v594_v44  ;;  %s1013_s9 = sld [smem:[#allocation4 + $0x20]] }
 0x17d   :  { %s495_s14 = smul.f32 %s494_s2, %s1568_s13  ;;  %s1663_s13 = sld [smem:[#allocation4 + $0x28]] }
 0x17e   :  { %s529_s5 = ssub.f32 %s520_s30, %s528_s4 }
 0x17f   :  { %s496_s18 = ssub.f32 %s1008_s12, %s495_s14  ;;  %s1014_s14 = sld [smem:[#allocation4 + $0x29]] }
 0x180   :  { %s530_s6 = smax.f32 %s1274_s19, %s529_s5  ;;  %s608_s12 = smul.f32 2.0, %s1700_s8 }
 0x181   :  { %s531_s7 = sadd.f32 1e-05, %s530_s6  ;;  %v846_v32 = vstv %s496_s18  ;;  %v851_v11 = vstv %s1661_s0  ;;  %s609_s2 = smul.f32 %s1700_s8, %s1700_s8 }
 0x182   :  { %v847_v46 = vadd.f32 %v846_v32, %v845_v43 }
 0x183   :  { %v532_v58 = vstv %s531_s7  ;;  %s610_s16 = ssub.f32 %s608_s12, %s609_s2 }
 0x184   :  { %1177 = vrsqrt.f32 %v532_v58  ;;  %v849_v48 = vmul.f32 0.01, %v847_v46  ;;  %vm848_vm1 = vcmp.gt.f32.partialorder %v847_v46, 0.0 }
 0x185   :  { %1179 = vrcp.f32 %v393_v53  ;;  %v405_v53 = vmul.f32 %v1583_v49, %v1396_v10 }
 0x186   :  { %1181 = vtanh.f32 %v429_v12  ;;  %v862_v12 = vstv %s1668_s24  ;;  %v850_v13 = vsel %vm848_vm1, %v847_v46, %v849_v48  ;;  %v636_v37 = vpop.xlane.xlu1 %635 }
 0x187   :  { %1183 = vpow2.f32 %v1005_v15  ;;  %v852_v10 = vmul.f32 %v851_v11, %v850_v13  ;;  %v637_v38 = vrot.slane %v636_v37, 4 }
 0x18e   :  { %v1178_v22 = vpop.eup %1177 }
 0x18f   :  { %1056 = vpush %v1178_v22  ;;  %v1180_v60 = vpop.eup %1179  ;;  %v586_v22 = vrot.slane %v585_v57, 2 }
 0x190   :  { %1058 = vpush %v547_v2  ;;  %v1182_v5 = vpop.eup %1181  ;;  %v431_v20 = vsub.f32 1.0, %v1180_v60  ;;  %v433_v6 = vmul.f32 %v1180_v60, %v1535_v50  ;;  %v597_v2 = vrot.slane %v596_v52, 2 }
 0x191   :  { %1060 = vpush %v558_v62  ;;  %v1184_v61 = vpop.eup %1183  ;;  %v587_v27 = vadd.f32 %v586_v22, %v585_v57 }
 0x192   :  { %v432_v1 = vmul.f32 %v1182_v5, %v431_v20  ;;  %v414_v40 = vadd.f32 1.0, %v1184_v61  ;;  %v598_v9 = vadd.f32 %v597_v2, %v596_v52 }
 0x194   :  { %v434_v14 = vadd.f32 %v433_v6, %v432_v1  ;;  %1185 = vrcp.f32 %v414_v40  ;;  %v438_v1 = vadd.f32 %v437_v7, %v1408_v41  ;;  %v599_v34 = vrot.slane %v598_v9, 1 }
 0x195   :  { %1187 = vpow2.f32 %v1006_v45  ;;  %v638_v40 = vadd.f32 %v637_v38, %v636_v37 }
 0x196   :  { %v1634_v16 = vmul.f32 %v1415_v59, %v434_v14  ;;  %v600_v55 = vadd.f32 %v599_v34, %v598_v9 }
 0x197   :  { %v639_v48 = vrot.slane %v638_v40, 2 }
 0x198   :  { %708 = vadd.xlane.f32.xlu0 %v1634_v16  ;;  %v718_v24 = vmul.f32 %v1634_v16, %v1634_v16 }
 0x199   :  { %v640_v57 = vadd.f32 %v639_v48, %v638_v40 }
 0x19a   :  { %719 = vadd.xlane.f32.xlu1 %v718_v24 }
 0x19e   :  { %v1186_v50 = vpop.eup %1185 }
 0x19f   :  { %v1188_v6 = vpop.eup %1187 }
 0x1a0   :  { %v423_v8 = vadd.f32 1.0, %v1188_v6 }
 0x1c0   :  { %s1057_s20 = spop %1056 }
 0x1c1   :  { %s535_s23 = smul.f32 %s1057_s20, %s1010_s15  ;;  %s1059_s1 = spop %1058 }
 0x1c2   :  { %s1671_s25 = smul.f32 %s1059_s1, %s1563_s11  ;;  %s1061_s28 = spop %1060 }
 0x1c3   :  { %s536_s26 = smul.f32 %s1602_s22, %s535_s23  ;;  %v855_v58 = vstv %s535_s23 }
 0x1c4   :  { %s569_s29 = smul.f32 %s568_s21, %s1671_s25  ;;  %v856_v0 = vmul.f32 %v855_v58, %v1440_v30  ;;  %v406_v30 = vadd.f32 %v405_v53, %v404_v63  ;;  %s1036_s21 = sld [smem:[#allocation4 + $0x3b]] }
 0x1c5   :  { %s537_s30 = smul.f32 %s536_s26, %s1618_s27 }
 0x1c6   :  { %s562_s4 = smul.f32 %s1061_s28, %s1563_s11  ;;  %v407_v5 = vadd.f32 %v406_v30, %v1404_v33  ;;  %v588_v33 = vrot.slane %v587_v27, 1 }
 0x1c7   :  { %s538_s5 = ssub.f32 %s1663_s13, %s537_s30  ;;  %s570_s6 = smul.f32 %s569_s29, %s1671_s25 }
 0x1c8   :  { %v439_v14 = vmul.f32 %v1186_v50, %v407_v5  ;;  %v589_v28 = vadd.f32 %v588_v33, %v587_v27 }
 0x1c9   :  { %v857_v56 = vstv %s538_s5  ;;  %s571_s22 = ssub.f32 %s562_s4, %s570_s6  ;;  %s1016_s4 = sld [smem:[#allocation4 + $0x21]] }
 0x1ca   :  { %v858_v23 = vadd.f32 %v857_v56, %v856_v0  ;;  %v440_v31 = vadd.f32 %v439_v14, %v438_v1  ;;  %v873_v46 = vstv %s1036_s21 }
 0x1cb   :  { %s572_s27 = smax.f32 %s1274_s19, %s571_s22  ;;  %s1017_s22 = sld [smem:[#allocation4 + $0x2a]] }
 0x1cc   :  { %vm859_vm2 = vcmp.gt.f32.partialorder %v858_v23, 0.0  ;;  %v860_v17 = vmul.f32 0.01, %v858_v23  ;;  %s573_s7 = sadd.f32 1e-05, %s572_s27 }
 0x1ce   :  { %v861_v62 = vsel %vm859_vm2, %v858_v23, %v860_v17  ;;  %v574_v60 = vstv %s573_s7  ;;  %v641_v23 = vrot.slane %v640_v57, 1 }
 0x1cf   :  { %v863_v20 = vmul.f32 %v862_v12, %v861_v62  ;;  %1189 = vrsqrt.f32 %v574_v60  ;;  %v448_v12 = vld [vmem:[#allocation8 + $0x20] sm:$0xff] }
 0x1d0   :  { %1191 = vrcp.f32 %v423_v8  ;;  %v642_v11 = vadd.f32 %v641_v23, %v640_v57  ;;  %v1717_v13 = vmul.f32 %v1415_v59, %v448_v12 }
 0x1d1   :  { %v1691_v24 = vadd.f32 %v863_v20, %v852_v10  ;;  %1193 = vtanh.f32 %v440_v31 }
 0x1d2   :  { %v802_v17 = vmul.f32 %v1717_v13, %v1717_v13 }
 0x1d9   :  { %v1190_v3 = vpop.eup %1189 }
 0x1da   :  { %1062 = vpush %v1190_v3  ;;  %v1192_v21 = vpop.eup %1191 }
 0x1db   :  { %1064 = vpush %v589_v28  ;;  %v1194_v15 = vpop.eup %1193  ;;  %v442_v41 = vsub.f32 1.0, %v1192_v21  ;;  %v444_v26 = vmul.f32 %v1192_v21, %v1583_v49  ;;  %v625_v49 = vpop.xlane.xlu0 %624 }
 0x1dc   :  { %1066 = vpush %v600_v55  ;;  %v626_v32 = vrot.slane %v625_v49, 4 }
 0x1dd   :  { %v443_v35 = vmul.f32 %v1194_v15, %v442_v41  ;;  %v678_v30 = vpop.xlane.xlu1 %677 }
 0x1de   :  { %v627_v39 = vadd.f32 %v626_v32, %v625_v49  ;;  %v679_v62 = vrot.slane %v678_v30, 4 }
 0x1df   :  { %v445_v36 = vadd.f32 %v444_v26, %v443_v35 }
 0x1e0   :  { %v628_v58 = vrot.slane %v627_v39, 2  ;;  %v680_v10 = vadd.f32 %v679_v62, %v678_v30 }
 0x1e1   :  { %v1695_v42 = vmul.f32 %v1415_v59, %v445_v36  ;;  %v667_v59 = vpop.xlane.xlu0 %666 }
 0x1e2   :  { %v668_v2 = vrot.slane %v667_v59, 4  ;;  %v681_v27 = vrot.slane %v680_v10, 2 }
 0x1e3   :  { %750 = vadd.xlane.f32.xlu0 %v1695_v42  ;;  %v760_v19 = vmul.f32 %v1695_v42, %v1695_v42 }
 0x1e4   :  { %v669_v7 = vadd.f32 %v668_v2, %v667_v59 }
 0x1e5   :  { %761 = vadd.xlane.f32.xlu1 %v760_v19 }
 0x1e6   :  { %v670_v1 = vrot.slane %v669_v7, 2 }
 0x1e7   :  { %792 = vadd.xlane.f32.xlu0 %v1717_v13 }
 0x1e8   :  { %v671_v9 = vadd.f32 %v670_v1, %v669_v7 }
 0x1e9   :  { %803 = vadd.xlane.f32.xlu1 %v802_v17 }
 0x1ea   :  { %v672_v33 = vrot.slane %v671_v9, 1 }
 0x1ec   :  { %v673_v28 = vadd.f32 %v672_v33, %v671_v9 }
 0x20b   :  { %s1063_s15 = spop %1062 }
 0x20c   :  { %s577_s17 = smul.f32 %s1063_s15, %s1013_s9  ;;  %s1065_s18 = spop %1064 }
 0x20d   :  { %s1706_s0 = smul.f32 %s1065_s18, %s1563_s11  ;;  %s1067_s20 = spop %1066 }
 0x20e   :  { %s578_s13 = smul.f32 %s1648_s10, %s577_s17  ;;  %v866_v29 = vstv %s577_s17 }
 0x20f   :  { %s611_s23 = smul.f32 %s610_s16, %s1706_s0  ;;  %v867_v61 = vmul.f32 %v866_v29, %v1489_v25  ;;  %v629_v25 = vadd.f32 %v628_v58, %v627_v39  ;;  %s1037_s16 = sld [smem:[#allocation4 + $0x3c]] }
 0x210   :  { %s579_s1 = smul.f32 %s578_s13, %s1671_s25  ;;  %s1722_s25 = sld [smem:[#allocation4 + $0x34]] }
 0x211   :  { %s604_s24 = smul.f32 %s1067_s20, %s1563_s11  ;;  %v630_v52 = vrot.slane %v629_v25, 1 }
 0x212   :  { %s580_s26 = ssub.f32 %s1014_s14, %s579_s1  ;;  %s612_s28 = smul.f32 %s611_s23, %s1706_s0 }
 0x213   :  { %v631_v53 = vadd.f32 %v630_v52, %v629_v25 }
 0x214   :  { %v868_v43 = vstv %s580_s26  ;;  %s613_s29 = ssub.f32 %s604_s24, %s612_s28  ;;  %s1019_s24 = sld [smem:[#allocation4 + $0x22]] }
 0x215   :  { %v869_v44 = vadd.f32 %v868_v43, %v867_v61  ;;  %v884_v6 = vstv %s1037_s16 }
 0x216   :  { %s614_s10 = smax.f32 %s1274_s19, %s613_s29  ;;  %s650_s5 = smul.f32 2.0, %s1722_s25 }
 0x217   :  { %vm870_vm3 = vcmp.gt.f32.partialorder %v869_v44, 0.0  ;;  %v871_v45 = vmul.f32 0.01, %v869_v44  ;;  %s615_s30 = sadd.f32 1e-05, %s614_s10  ;;  %s651_s6 = smul.f32 %s1722_s25, %s1722_s25 }
 0x218   :  { %s1020_s29 = sld [smem:[#allocation4 + $0x2b]] }
 0x219   :  { %v872_v47 = vsel %vm870_vm3, %v869_v44, %v871_v45  ;;  %v616_v4 = vstv %s615_s30  ;;  %s652_s7 = ssub.f32 %s650_s5, %s651_s6 }
 0x21a   :  { %v874_v0 = vmul.f32 %v873_v46, %v872_v47  ;;  %1195 = vrsqrt.f32 %v616_v4 }
 0x21c   :  { %v875_v56 = vadd.f32 %v874_v0, %v1691_v24 }
 0x224   :  { %v1196_v63 = vpop.eup %1195 }
 0x225   :  { %1068 = vpush %v1196_v63  ;;  %v709_v21 = vpop.xlane.xlu0 %708 }
 0x226   :  { %1070 = vpush %v631_v53  ;;  %v710_v26 = vrot.slane %v709_v21, 4 }
 0x227   :  { %1072 = vpush %v642_v11  ;;  %v720_v15 = vpop.xlane.xlu1 %719 }
 0x228   :  { %v721_v35 = vrot.slane %v720_v15, 4  ;;  %v711_v49 = vadd.f32 %v710_v26, %v709_v21 }
 0x22a   :  { %v722_v29 = vadd.f32 %v721_v35, %v720_v15  ;;  %v712_v61 = vrot.slane %v711_v49, 2 }
 0x22c   :  { %v723_v44 = vrot.slane %v722_v29, 2  ;;  %v713_v45 = vadd.f32 %v712_v61, %v711_v49 }
 0x22e   :  { %v714_v58 = vrot.slane %v713_v45, 1 }
 0x230   :  { %v715_v48 = vadd.f32 %v714_v58, %v713_v45 }
 0x256   :  { %s1069_s27 = spop %1068 }
 0x257   :  { %s619_s9 = smul.f32 %s1069_s27, %s1016_s4  ;;  %s1071_s12 = spop %1070 }
 0x258   :  { %s1728_s2 = smul.f32 %s1071_s12, %s1563_s11  ;;  %s1073_s15 = spop %1072 }
 0x259   :  { %s620_s14 = smul.f32 %s1700_s8, %s619_s9  ;;  %v877_v22 = vstv %s619_s9 }
 0x25a   :  { %s653_s17 = smul.f32 %s652_s7, %s1728_s2  ;;  %v878_v60 = vmul.f32 %v877_v22, %v1503_v18  ;;  %v682_v18 = vadd.f32 %v681_v27, %v680_v10  ;;  %s1038_s7 = sld [smem:[#allocation4 + $0x3d]] }
 0x25b   :  { %s621_s18 = smul.f32 %s620_s14, %s1706_s0  ;;  %s1737_s0 = sld [smem:[#allocation4 + $0x35]] }
 0x25c   :  { %s646_s13 = smul.f32 %s1073_s15, %s1563_s11  ;;  %v683_v34 = vrot.slane %v682_v18, 1 }
 0x25d   :  { %s622_s20 = ssub.f32 %s1017_s22, %s621_s18  ;;  %s654_s21 = smul.f32 %s653_s17, %s1728_s2 }
 0x25e   :  { %v684_v55 = vadd.f32 %v683_v34, %v682_v18 }
 0x25f   :  { %v879_v5 = vstv %s622_s20  ;;  %s655_s23 = ssub.f32 %s646_s13, %s654_s21  ;;  %s1022_s13 = sld [smem:[#allocation4 + $0x23]] }
 0x260   :  { %v880_v50 = vadd.f32 %v879_v5, %v878_v60  ;;  %v895_v38 = vstv %s1038_s7 }
 0x261   :  { %s656_s8 = smax.f32 %s1274_s19, %s655_s23  ;;  %s692_s26 = smul.f32 2.0, %s1737_s0 }
 0x262   :  { %vm881_vm4 = vcmp.gt.f32.partialorder %v880_v50, 0.0  ;;  %v882_v20 = vmul.f32 0.01, %v880_v50  ;;  %s657_s1 = sadd.f32 1e-05, %s656_s8  ;;  %s693_s28 = smul.f32 %s1737_s0, %s1737_s0 }
 0x263   :  { %s1023_s23 = sld [smem:[#allocation4 + $0x2c]] }
 0x264   :  { %v883_v14 = vsel %vm881_vm4, %v880_v50, %v882_v20  ;;  %v658_v24 = vstv %s657_s1  ;;  %s694_s30 = ssub.f32 %s692_s26, %s693_s28 }
 0x265   :  { %v885_v8 = vmul.f32 %v884_v6, %v883_v14  ;;  %1197 = vrsqrt.f32 %v658_v24 }
 0x267   :  { %v886_v31 = vadd.f32 %v885_v8, %v875_v56 }
 0x26f   :  { %v1198_v3 = vpop.eup %1197 }
 0x270   :  { %1074 = vpush %v1198_v3  ;;  %v751_v56 = vpop.xlane.xlu0 %750 }
 0x271   :  { %1076 = vpush %v673_v28  ;;  %v752_v52 = vrot.slane %v751_v56, 4 }
 0x272   :  { %1078 = vpush %v684_v55  ;;  %v762_v25 = vpop.xlane.xlu1 %761 }
 0x273   :  { %v763_v23 = vrot.slane %v762_v25, 4  ;;  %v753_v11 = vadd.f32 %v752_v52, %v751_v56 }
 0x274   :  { %v793_v24 = vpop.xlane.xlu0 %792 }
 0x275   :  { %v764_v17 = vadd.f32 %v763_v23, %v762_v25  ;;  %v754_v22 = vrot.slane %v753_v11, 2  ;;  %v794_v9 = vrot.slane %v793_v24, 4 }
 0x276   :  { %v804_v27 = vpop.xlane.xlu1 %803 }
 0x277   :  { %v765_v60 = vrot.slane %v764_v17, 2  ;;  %v755_v7 = vadd.f32 %v754_v22, %v753_v11  ;;  %v795_v34 = vadd.f32 %v794_v9, %v793_v24 }
 0x279   :  { %v756_v10 = vrot.slane %v755_v7, 1  ;;  %v796_v15 = vrot.slane %v795_v34, 2 }
 0x27b   :  { %v757_v1 = vadd.f32 %v756_v10, %v755_v7 }
 0x2a1   :  { %s1075_s10 = spop %1074 }
 0x2a2   :  { %s661_s4 = smul.f32 %s1075_s10, %s1019_s24  ;;  %s1077_s5 = spop %1076 }
 0x2a3   :  { %s1743_s6 = smul.f32 %s1077_s5, %s1563_s11  ;;  %s1079_s27 = spop %1078 }
 0x2a4   :  { %s662_s22 = smul.f32 %s1722_s25, %s661_s4  ;;  %v888_v41 = vstv %s661_s4  ;;  %s1039_s4 = sld [smem:[#allocation4 + $0x3e]] }
 0x2a5   :  { %s695_s9 = smul.f32 %s694_s30, %s1743_s6  ;;  %v889_v36 = vmul.f32 %v888_v41, %v1539_v51  ;;  %v724_v51 = vadd.f32 %v723_v44, %v722_v29 }
 0x2a6   :  { %s663_s12 = smul.f32 %s662_s22, %s1728_s2  ;;  %s1752_s2 = sld [smem:[#allocation4 + $0x36]] }
 0x2a7   :  { %s688_s14 = smul.f32 %s1079_s27, %s1563_s11  ;;  %v725_v47 = vrot.slane %v724_v51, 1 }
 0x2a8   :  { %s664_s15 = ssub.f32 %s1020_s29, %s663_s12  ;;  %s696_s16 = smul.f32 %s695_s9, %s1743_s6 }
 0x2a9   :  { %v726_v0 = vadd.f32 %v725_v47, %v724_v51 }
 0x2aa   :  { %v890_v19 = vstv %s664_s15  ;;  %s697_s17 = ssub.f32 %s688_s14, %s696_s16  ;;  %v906_v30 = vstv %s1039_s4  ;;  %s1025_s14 = sld [smem:[#allocation4 + $0x24]] }
 0x2ab   :  { %v891_v37 = vadd.f32 %v890_v19, %v889_v36  ;;  %v797_v19 = vadd.f32 %v796_v15, %v795_v34 }
 0x2ac   :  { %s698_s25 = smax.f32 %s1274_s19, %s697_s17  ;;  %s734_s20 = smul.f32 2.0, %s1752_s2 }
 0x2ad   :  { %vm892_vm5 = vcmp.gt.f32.partialorder %v891_v37, 0.0  ;;  %v893_v32 = vmul.f32 0.01, %v891_v37  ;;  %s699_s18 = sadd.f32 1e-05, %s698_s25  ;;  %s735_s21 = smul.f32 %s1752_s2, %s1752_s2 }
 0x2ae   :  { %s1026_s17 = sld [smem:[#allocation4 + $0x2d]] }
 0x2af   :  { %v894_v43 = vsel %vm892_vm5, %v891_v37, %v893_v32  ;;  %v700_v39 = vstv %s699_s18  ;;  %s736_s1 = ssub.f32 %s734_s20, %s735_s21  ;;  %v798_v37 = vrot.slane %v797_v19, 1 }
 0x2b0   :  { %v896_v40 = vmul.f32 %v895_v38, %v894_v43  ;;  %1199 = vrsqrt.f32 %v700_v39 }
 0x2b1   :  { %v799_v38 = vadd.f32 %v798_v37, %v797_v19 }
 0x2b2   :  { %v897_v46 = vadd.f32 %v896_v40, %v886_v31  ;;  %v805_v31 = vrot.slane %v804_v27, 4 }
 0x2b4   :  { %v806_v28 = vadd.f32 %v805_v31, %v804_v27 }
 0x2b6   :  { %v807_v26 = vrot.slane %v806_v28, 2 }
 0x2ba   :  { %v1200_v4 = vpop.eup %1199 }
 0x2bb   :  { %1080 = vpush %v1200_v4 }
 0x2bc   :  { %1082 = vpush %v715_v48 }
 0x2bd   :  { %1084 = vpush %v726_v0 }
 0x2ec   :  { %s1081_s8 = spop %1080 }
 0x2ed   :  { %s703_s24 = smul.f32 %s1081_s8, %s1022_s13  ;;  %s1083_s26 = spop %1082 }
 0x2ee   :  { %s1758_s28 = smul.f32 %s1083_s26, %s1563_s11  ;;  %s1085_s10 = spop %1084 }
 0x2ef   :  { %s704_s29 = smul.f32 %s1737_s0, %s703_s24  ;;  %v899_v57 = vstv %s703_s24  ;;  %s1040_s24 = sld [smem:[#allocation4 + $0x3f]] }
 0x2f0   :  { %s737_s30 = smul.f32 %s736_s1, %s1758_s28  ;;  %v900_v63 = vmul.f32 %v899_v57, %v1587_v54  ;;  %v766_v54 = vadd.f32 %v765_v60, %v764_v17 }
 0x2f1   :  { %s705_s5 = smul.f32 %s704_s29, %s1743_s6  ;;  %s1767_s6 = sld [smem:[#allocation4 + $0x37]] }
 0x2f2   :  { %s730_s22 = smul.f32 %s1085_s10, %s1563_s11  ;;  %v767_v20 = vrot.slane %v766_v54, 1 }
 0x2f3   :  { %s706_s27 = ssub.f32 %s1023_s23, %s705_s5  ;;  %s738_s7 = smul.f32 %s737_s30, %s1758_s28 }
 0x2f4   :  { %v768_v14 = vadd.f32 %v767_v20, %v766_v54 }
 0x2f5   :  { %v901_v53 = vstv %s706_s27  ;;  %s739_s9 = ssub.f32 %s730_s22, %s738_s7  ;;  %v917_v21 = vstv %s1040_s24  ;;  %s1028_s22 = sld [smem:[#allocation4 + $0x25]] }
 0x2f6   :  { %v902_v12 = vadd.f32 %v901_v53, %v900_v63 }
 0x2f7   :  { %s740_s0 = smax.f32 %s1274_s19, %s739_s9  ;;  %s776_s15 = smul.f32 2.0, %s1767_s6 }
 0x2f8   :  { %vm903_vm6 = vcmp.gt.f32.partialorder %v902_v12, 0.0  ;;  %v904_v59 = vmul.f32 0.01, %v902_v12  ;;  %s741_s12 = sadd.f32 1e-05, %s740_s0  ;;  %s777_s16 = smul.f32 %s1767_s6, %s1767_s6 }
 0x2f9   :  { %s1029_s9 = sld [smem:[#allocation4 + $0x2e]] }
 0x2fa   :  { %v905_v2 = vsel %vm903_vm6, %v902_v12, %v904_v59  ;;  %v742_v62 = vstv %s741_s12  ;;  %s778_s18 = ssub.f32 %s776_s15, %s777_s16 }
 0x2fb   :  { %1201 = vrsqrt.f32 %v742_v62  ;;  %v907_v5 = vmul.f32 %v906_v30, %v905_v2 }
 0x2fd   :  { %v908_v50 = vadd.f32 %v907_v5, %v897_v46 }
 0x305   :  { %v1202_v6 = vpop.eup %1201 }
 0x306   :  { %1086 = vpush %v1202_v6 }
 0x307   :  { %1088 = vpush %v757_v1 }
 0x308   :  { %1090 = vpush %v768_v14 }
 0x337   :  { %s1087_s25 = spop %1086 }
 0x338   :  { %s745_s13 = smul.f32 %s1087_s25, %s1025_s14  ;;  %s1089_s20 = spop %1088 }
 0x339   :  { %s1773_s21 = smul.f32 %s1089_s20, %s1563_s11  ;;  %s1091_s8 = spop %1090 }
 0x33a   :  { %s746_s23 = smul.f32 %s1752_s2, %s745_s13  ;;  %v910_v8 = vstv %s745_s13  ;;  %s1041_s13 = sld [smem:[#allocation4 + $0x40]] }
 0x33b   :  { %s779_s1 = smul.f32 %s778_s18, %s1773_s21  ;;  %v911_v18 = vmul.f32 %v910_v8, %v1634_v16  ;;  %v808_v16 = vadd.f32 %v807_v26, %v806_v28 }
 0x33c   :  { %s747_s26 = smul.f32 %s746_s23, %s1758_s28  ;;  %s1782_s28 = sld [smem:[#allocation4 + $0x38]] }
 0x33d   :  { %s772_s29 = smul.f32 %s1091_s8, %s1563_s11  ;;  %v809_v29 = vrot.slane %v808_v16, 1 }
 0x33e   :  { %s748_s10 = ssub.f32 %s1026_s17, %s747_s26  ;;  %s780_s30 = smul.f32 %s779_s1, %s1773_s21 }
 0x33f   :  { %v810_v61 = vadd.f32 %v809_v29, %v808_v16 }
 0x340   :  { %v912_v33 = vstv %s748_s10  ;;  %s781_s4 = ssub.f32 %s772_s29, %s780_s30  ;;  %v928_v46 = vstv %s1041_s13 }
 0x341   :  { %v913_v3 = vadd.f32 %v912_v33, %v911_v18 }
 0x342   :  { %s782_s2 = smax.f32 %s1274_s19, %s781_s4  ;;  %s818_s27 = smul.f32 2.0, %s1782_s28 }
 0x343   :  { %vm914_vm7 = vcmp.gt.f32.partialorder %v913_v3, 0.0  ;;  %v915_v55 = vmul.f32 0.01, %v913_v3  ;;  %s783_s5 = sadd.f32 1e-05, %s782_s2  ;;  %s819_s7 = smul.f32 %s1782_s28, %s1782_s28 }
 0x344   :  { %s1042_s4 = sld [smem:[#allocation4 + $0x41]] }
 0x345   :  { %v784_v41 = vstv %s783_s5  ;;  %v916_v35 = vsel %vm914_vm7, %v913_v3, %v915_v55  ;;  %s820_s12 = ssub.f32 %s818_s27, %s819_s7  ;;  %s1043_s5 = sld [smem:[#allocation4 + $0x42]] }
 0x346   :  { %1203 = vrsqrt.f32 %v784_v41  ;;  %v918_v36 = vmul.f32 %v917_v21, %v916_v35 }
 0x348   :  { %v919_v49 = vadd.f32 %v918_v36, %v908_v50 }
 0x34a   :  { %v939_v52 = vstv %s1042_s4 }
 0x34b   :  { %v942_v53 = vstv %s1043_s5 }
 0x350   :  { %v1204_v32 = vpop.eup %1203 }
 0x351   :  { %1092 = vpush %v1204_v32 }
 0x352   :  { %1094 = vpush %v799_v38 }
 0x353   :  { %1096 = vpush %v810_v61 }
 0x382   :  { %s1093_s0 = spop %1092 }
 0x383   :  { %s787_s14 = smul.f32 %s1093_s0, %s1028_s22  ;;  %s1095_s15 = spop %1094 }
 0x384   :  { %s1788_s16 = smul.f32 %s1095_s15, %s1563_s11  ;;  %s1097_s25 = spop %1096 }
 0x385   :  { %s788_s17 = smul.f32 %s1767_s6, %s787_s14  ;;  %v921_v43 = vstv %s787_s14  ;;  %s1275_s22 = smov [#allocation9]  }
 0x386   :  { %s821_s18 = smul.f32 %s820_s12, %s1788_s16  ;;  %v922_v39 = vmul.f32 %v921_v43, %v1695_v42  ;;  %s951_s27 = sshll.u32 %s1275_s22, 4  ;;  %s952_s27 = int_to_ptr.vmem [resolvable:$true] %s951_s27 }
 0x387   :  { %s789_s20 = smul.f32 %s788_s17, %s1773_s21  ;;  %s1032_s21 = sld [smem:[#allocation4 + $0x2f]] }
 0x388   :  { %s814_s23 = smul.f32 %s1097_s25, %s1563_s11  ;;  %s1031_s11 = sld [smem:[#allocation4 + $0x26]] }
 0x389   :  { %s790_s8 = ssub.f32 %s1029_s9, %s789_s20  ;;  %s822_s1 = smul.f32 %s821_s18, %s1788_s16 }
 0x38a   :  { %p1246_p0 = scmp.lt.s32.totalorder %s952_s27, %s952_s27 }
 0x38b   :  { %v923_v44 = vstv %s790_s8  ;;  %s823_s24 = ssub.f32 %s814_s23, %s822_s1 }
 0x38c   :  { %v924_v40 = vadd.f32 %v923_v44, %v922_v39 }
 0x38d   :  { %s824_s26 = smax.f32 %s1274_s19, %s823_s24 }
 0x38e   :  { %vm925_vm8 = vcmp.gt.f32.partialorder %v924_v40, 0.0  ;;  %v926_v45 = vmul.f32 0.01, %v924_v40  ;;  %s825_s6 = sadd.f32 1e-05, %s824_s26 }
 0x390   :  { %v826_v51 = vstv %s825_s6  ;;  %v927_v58 = vsel %vm925_vm8, %v924_v40, %v926_v45 }
 0x391   :  { %1205 = vrsqrt.f32 %v826_v51  ;;  %v929_v47 = vmul.f32 %v928_v46, %v927_v58 }
 0x393   :  { %v930_v4 = vadd.f32 %v929_v47, %v919_v49 }
 0x39b   :  { %v1206_v48 = vpop.eup %1205 }
 0x39c   :  { %1098 = vpush %v1206_v48 }
 0x3cd   :  { %s1099_s29 = spop %1098 }
 0x3ce   :  { %s829_s10 = smul.f32 %s1099_s29, %s1031_s11 }
 0x3d0   :  { %s830_s30 = smul.f32 %s1782_s28, %s829_s10  ;;  %v932_v42 = vstv %s829_s10  ;;  %s1241_s28 = scalar_lea.vmem %s952_s27, 128 }
 0x3d1   :  { %v933_v0 = vmul.f32 %v932_v42, %v1717_v13  ;;  %p1242_p13 = scmp.ne.s32.totalorder %s952_s27, %s1241_s28  ;;  %p1247_p1 = scmp.lt.s32.totalorder %s1241_s28, %s1241_s28 }
 0x3d2   :  { %s831_s19 = smul.f32 %s830_s30, %s1788_s16 }
 0x3d3   :  { %p1248_p2 = por %p1247_p1, %p1246_p0 }
 0x3d4   :  { %s832_s2 = ssub.f32 %s1032_s21, %s831_s19 }
 0x3d5   :  { %p1249_p3 = pnand %p1248_p2, %p1242_p13 }
 0x3d6   :  { %v934_v56 = vstv %s832_s2 }
 0x3d7   :  { %v935_v25 = vadd.f32 %v934_v56, %v933_v0 }
 0x3d9   :  { %v937_v57 = vmul.f32 0.01, %v935_v25  ;;  %vm936_vm9 = vcmp.gt.f32.partialorder %v935_v25, 0.0 }
 0x3db   :  { %v938_v23 = vsel %vm936_vm9, %v935_v25, %v937_v57 }
 0x3dc   :  { %v940_v63 = vmul.f32 %v939_v52, %v938_v23 }
 0x3de   :  { %v941_v11 = vadd.f32 %v940_v63, %v930_v4 }
 0x3e0   :  { %v943_v12 = vadd.f32 %v942_v53, %v941_v11 }
 0x3e2   :  { %944 = vst [vmem:[#allocation9] sm:$0xff] %v943_v12 }
 0x3e3   :  { %1252 = shalt.err (!%p1249_p3)
}
 0x3e4   :  { %s1253_s0 = scalar_lea.hbm %s1815_s3, 128 }
 0x3e5   :  { %p1254_p4 = scmp.ne.s32.totalorder %s1815_s3, %s1253_s0  ;;  %p1257_p5 = scmp.lt.u32.totalorder %s1253_s0, %s1815_s3 }
 0x3e7   :  { %p1259_p6 = pnand %p1257_p5, %p1254_p4 }
 0x3e9   :  { %1262 = shalt.err (!%p1259_p6)
}
 0x3ea   :  { %954 = dma.vmem_to_hbm [thread:$0]  %s952_s27, 128, %s1815_s3, [#allocation6]  }
 0x3eb   :  { %1267 = dma.done.wait [#allocation6], 128  }
 0x3ec   :  { %1268 = vsyncadd [#allocation6], 4294967168 }
 0x3ed   :  { %958 = vsyncpa [#allocation5], 1 }
 0x3ee   :  { %959 = vsyncpa [#allocation6], 1 }
 0x3ef   :  { %960 = vsyncpa [#allocation7], 1 }

</bundles_post_ra>
